<compile_context>
chip_gen: v7x
topology: tpu7x:2x2x1
jax: 0.10.0
libtpu: 0.0.40
codegen_flags: <defaults>
</compile_context>

<pallas_src>
import numpy as np
import jax
import jax.numpy as jnp
from jax import lax
from jax.experimental import pallas as pl
from jax.experimental.pallas import tpu as pltpu

F32 = jnp.float32
C2 = 8                   # feature channels after the grouped spatial conv
POOL1, POOL2 = 4, 8
LANE = 128               # TPU lane count; batch tiles are multiples of this


def eegnet4_dims(T, freq):
    K1 = freq // 2              # Conv2d(1,4,(1,freq//2)) temporal kernel width
    P1 = freq // 4              # its padding
    WPIN = T + 2 * P1           # zero-padded input width fed to conv1
    W1 = WPIN - K1 + 1          # width after conv1
    WP = W1 // POOL1            # width after AvgPool2d((1,4)) (floor)
    K3 = freq // 4              # depthwise conv kernel width
    P3 = freq // 4              # its padding
    WPAD3 = WP + 2 * P3         # zero-padded width fed to the depthwise conv
    W3 = WPAD3 - K3 + 1         # width after conv3 / conv4
    WOUT = W3 // POOL2          # width after AvgPool2d((1,8)) (floor)
    return dict(K1=K1, P1=P1, WPIN=WPIN, W1=W1, WP=WP, K3=K3, P3=P3,
                WPAD3=WPAD3, W3=W3, WOUT=WOUT)


def eegnet4_kernel(x_ref,      # (H*WPIN, TB)        VMEM  batch on lanes, compute dtype
                   sa_ref,     # (C2*W1, H*WPIN)     VMEM  conv1 o conv2 o BN1/BN2 fold
                   b1_ref,     # (C2*W1, 1)          VMEM  folded stage-1 bias (f32)
                   sb_ref,     # (C2*W3, C2*W1)      VMEM  pool1 o conv3 o conv4 o BN3 fold
                   b2_ref,     # (C2*W3, 1)          VMEM  folded stage-2 bias (f32)
                   sp_ref,     # (C2*WOUT, C2*W3)    VMEM  pool2 + channel scatter
                   out_ref):   # (C2*WOUT, TB)       VMEM  lane-dense output tile
    cdt = sa_ref.dtype

    def elu(v):                 # torch ELU, alpha=1
        return jnp.where(v > 0, v, jnp.exp(jnp.minimum(v, 0.0)) - 1.0)

    # conv1 (temporal) o conv2 (spatial, groups=4), BN1/BN2 folded -> ELU.
    pre1 = jnp.dot(sa_ref[...], x_ref[...], preferred_element_type=F32) + b1_ref[...]
    a1 = elu(pre1)
    # TODO(synk): Dropout(p=0.25) is identity at inference time (omitted).

    # AvgPool(1,4) o zero-pad o depthwise conv3 o 1x1 conv4 o BN3 -> ELU (all folded in SB).
    pre2 = jnp.dot(sb_ref[...], a1.astype(cdt), preferred_element_type=F32) + b2_ref[...]
    a2 = elu(pre2)

    # AvgPool(1,8) + scatter each channel into its output rows: single lane-dense store.
    out_ref[...] = jnp.dot(sp_ref[...], a2.astype(cdt), preferred_element_type=F32)


def build_constants(params, H, d):
    """Fold BN + convs + pools into three constant matrices and two bias columns."""
    K1, WPIN, W1 = d["K1"], d["WPIN"], d["W1"]
    K3, P3, WP = d["K3"], d["P3"], d["WP"]
    WPAD3, W3, WOUT = d["WPAD3"], d["W3"], d["WOUT"]

    grp = np.arange(C2) // 2                 # conv2 group (=conv1 channel) per output
    w1 = params["w1"].astype(F32)            # (4, K1)
    w2 = params["w2"].astype(F32)            # (C2, H)
    w3 = params["w3"].astype(F32)            # (C2, K3)
    w4 = params["w4"].astype(F32)            # (C2, C2)
    s1, h1 = params["s1"], params["h1"]
    s2, h2 = params["s2"], params["h2"]
    s3, h3 = params["s3"], params["h3"]

    # Fold BN1/BN2 into the spatial mix, BN3 into the 1x1 conv.
    w2f = w2 * (s1[grp] * s2)[:, None]                                  # (C2, H)
    bias1 = s2 * (params["b2"] + h1[grp] * jnp.sum(w2, axis=1)) + h2    # (C2,)
    w4f = w4 * s3[:, None]                                              # (C2, C2)
    b4f = params["b4"] * s3 + h3                                        # (C2,)

    # SA: (C2*W1, H*WPIN) -- spatial mix composed with banded temporal-conv Toeplitz.
    dif1 = np.arange(WPIN)[None, :] - np.arange(W1)[:, None]            # (W1, WPIN): p - w
    v1 = jnp.asarray((dif1 >= 0) & (dif1 < K1))
    toep1 = jnp.where(v1, w1[:, np.clip(dif1, 0, K1 - 1)], 0.0)         # (4, W1, WPIN)
    sa = jnp.einsum("oh,owp->owhp", w2f, toep1[grp]).reshape(C2 * W1, H * WPIN)
    bias1_col = jnp.repeat(bias1, W1).reshape(C2 * W1, 1).astype(F32)

    # SB: (C2*W3, C2*W1) -- AvgPool(1,4) o zero-pad o depthwise-conv Toeplitz o w4f mix.
    pool1 = np.zeros((W1, WPAD3), np.float32)
    for u in range(WP):
        pool1[POOL1 * u:POOL1 * (u + 1), P3 + u] = 1.0 / POOL1
    dif3 = np.arange(WPAD3)[:, None] - np.arange(W3)[None, :]           # (WPAD3, W3): q - w
    v3 = jnp.asarray((dif3 >= 0) & (dif3 < K3))
    toep3 = jnp.where(v3, w3[:, np.clip(dif3, 0, K3 - 1)], 0.0)         # (C2, WPAD3, W3)
    m = jnp.einsum("vq,iqw->ivw", jnp.asarray(pool1), toep3)            # (C2, W1, W3)
    sb = jnp.einsum("oi,ivw->owiv", w4f, m).reshape(C2 * W3, C2 * W1)
    bias2_col = jnp.repeat(w4f @ params["b3"] + b4f, W3).reshape(C2 * W3, 1).astype(F32)

    # SP: (C2*WOUT, C2*W3) -- block-diagonal AvgPool(1,8) + per-channel scatter (1/8 folded).
    sp = np.zeros((C2 * WOUT, C2 * W3), np.float32)
    for o in range(C2):
        for u in range(WOUT):
            sp[o * WOUT + u, o * W3 + POOL2 * u: o * W3 + POOL2 * (u + 1)] = 1.0 / POOL2
    # TODO(synk): for very long time windows (large T/freq) SA/SB grow O(T^2); switch to a
    # time-tiled grid axis with the tap-loop formulation instead of fully folded constants.
    return sa, bias1_col, sb, bias2_col, jnp.asarray(sp)


def _choose_batch_tile(B, H, d, bpe):
    """Batch tile (multiple of 128) from an explicit VMEM budget; keep >= 2 grid steps
    when the padded batch allows it so the 'parallel' axis spans both v7x TensorCores."""
    feat_in, feat_out = H * d["WPIN"], C2 * d["WOUT"]
    const_bytes = bpe * (C2 * d["W1"] * feat_in + C2 * d["W3"] * C2 * d["W1"]
                         + feat_out * C2 * d["W3"]) + 4 * (C2 * d["W1"] + C2 * d["W3"])
    budget = 20 << 20            # conservative vs v7x's 64 MiB physical / 32 MiB scoped VMEM
    per_b = 2 * (bpe * feat_in + 4 * feat_out)       # double-buffered input/output blocks
    tb = max(LANE, min(((budget - const_bytes) // per_b) // LANE * LANE, 2048))
    bp = ((B + LANE - 1) // LANE) * LANE
    tb = min(tb, bp)
    if bp // tb < 2 <= bp // LANE:                   # nb >= 2 when possible (v7x megacore)
        tb = max(LANE, (bp // 2) // LANE * LANE)
    bp = ((bp + tb - 1) // tb) * tb
    return bp, tb, const_bytes


def _default_bf16_matmul():
    """bf16 matmul operands on v6e/v7x (bf16-native MXU); keep f32 on v5e and older."""
    try:
        kind = jax.devices()[0].device_kind.lower()
    except Exception:
        return False
    return ("v6" in kind) or ("v7" in kind)


def eegnet4_forward(x, params, *, freq, use_bf16_matmul=None):
    """Pallas implementation of EEGNet4.forward (mod == 0, inference mode)."""
    B, H, T = x.shape
    d = eegnet4_dims(T, freq)
    assert d["WOUT"] >= 1, "time/freq too small: AvgPool(1,8) output is empty"
    if use_bf16_matmul is None:
        use_bf16_matmul = _default_bf16_matmul()
    cdt = jnp.bfloat16 if use_bf16_matmul else F32
    bpe = 2 if use_bf16_matmul else 4

    WPIN, W1, W3, WOUT = d["WPIN"], d["W1"], d["W3"], d["WOUT"]
    feat_in, feat_out = H * WPIN, C2 * WOUT
    Bp, TB, const_bytes = _choose_batch_tile(B, H, d, bpe)
    nb = Bp // TB

    # Input prep (glue): zero-pad the conv1 time window, pad batch to a lane-full
    # multiple of the tile, and put (electrode, time) on sublanes / batch on lanes.
    xp = jnp.pad(x.astype(F32), ((0, Bp - B), (0, 0), (d["P1"], d["P1"])))
    xT = jnp.transpose(xp, (1, 2, 0)).reshape(feat_in, Bp).astype(cdt)

    sa, b1c, sb, b2c, sp = build_constants(params, H, d)
    sa, sb, sp = sa.astype(cdt), sb.astype(cdt), sp.astype(cdt)

    # Explicit VMEM budget: double-buffered batch blocks + (single-buffered) constants.
    vmem_needed = 2 * TB * (bpe * feat_in + 4 * feat_out) + const_bytes
    vmem_limit = int(min(48 << 20, max(32 << 20, 2 * vmem_needed + (4 << 20))))

    flops = 2 * Bp * (C2 * W1 * feat_in + C2 * W3 * C2 * W1 + feat_out * C2 * W3)
    transcendentals = Bp * C2 * (W1 + W3)
    bytes_accessed = bpe * (xT.size + sa.size + sb.size + sp.size) \
        + 4 * (b1c.size + b2c.size + Bp * feat_out)

    def const_spec(arr, buffered):
        nd = arr.ndim
        if buffered:
            # Grid-invariant constant: single pipeline buffer saves VMEM (v7x 64 MiB).
            return pl.BlockSpec(arr.shape, lambda b: (0,) * nd,
                                pipeline_mode=pl.Buffered(1))
        return pl.BlockSpec(arr.shape, lambda b: (0,) * nd)

    out_T, last_err = None, None
    for buffered in (True, False):      # fall back to plain specs if Buffered(1) unsupported
        try:
            fn = pl.pallas_call(
                eegnet4_kernel,
                out_shape=jax.ShapeDtypeStruct((feat_out, Bp), F32),
                grid=(nb,),
                in_specs=[
                    pl.BlockSpec((feat_in, TB), lambda b: (0, b)),        # xT batch tiles
                    const_spec(sa, buffered), const_spec(b1c, buffered),
                    const_spec(sb, buffered), const_spec(b2c, buffered),
                    const_spec(sp, buffered),
                ],
                out_specs=pl.BlockSpec((feat_out, TB), lambda b: (0, b)),
                compiler_params=pltpu.CompilerParams(
                    dimension_semantics=("parallel",),
                    vmem_limit_bytes=vmem_limit),
                cost_estimate=pl.CostEstimate(flops=flops,
                                              transcendentals=transcendentals,
                                              bytes_accessed=bytes_accessed),
            )
            out_T = fn(xT, sa, b1c, sb, b2c, sp)
            break
        except Exception as e:          # pragma: no cover
            last_err = e
    if out_T is None:
        raise last_err

    out = jnp.transpose(out_T.reshape(C2, WOUT, Bp), (2, 0, 1))[:B]
    # Mirrors torch `.squeeze()` (note: also drops the batch dim when B == 1).
    return jnp.squeeze(out)


def init_params(key, H, freq):
    """Deterministic synthetic parameters (shapes follow EEGNet4.__init__)."""
    K1, K3 = freq // 2, freq // 4
    eps = 1e-5
    ks = jax.random.split(key, 10)

    def nrm(k, shape, s=0.2):
        return (s * jax.random.normal(k, shape)).astype(F32)

    def bn_fold(k, c):
        kg, kb = jax.random.split(k)
        gamma = 1.0 + 0.1 * jax.random.normal(kg, (c,))
        beta = 0.1 * jax.random.normal(kb, (c,))
        mean = jnp.zeros((c,), F32)          # PyTorch-default running stats
        var = jnp.ones((c,), F32)
        scale = gamma / jnp.sqrt(var + eps)
        shift = beta - mean * scale
        return scale.astype(F32), shift.astype(F32)

    w1 = nrm(ks[0], (4, K1))                 # Conv2d(1,4,(1,K1), bias=False)
    s1, h1 = bn_fold(ks[1], 4)
    w2 = nrm(ks[2], (8, H))                  # Conv2d(4,8,(H,1), groups=4)
    b2 = nrm(ks[3], (8,), 0.05)
    s2, h2 = bn_fold(ks[4], 8)
    w3 = nrm(ks[5], (8, K3))                 # Conv2d(8,8,(1,K3), groups=8)
    b3 = nrm(ks[6], (8,), 0.05)
    w4 = nrm(ks[7], (8, 8))                  # Conv2d(8,8,(1,1))
    b4 = nrm(ks[8], (8,), 0.05)
    s3, h3 = bn_fold(ks[9], 8)
    return dict(w1=w1, s1=s1, h1=h1, w2=w2, b2=b2, s2=s2, h2=h2,
                w3=w3, b3=b3, w4=w4, b4=b4, s3=s3, h3=h3)


def reference_forward(x, p, *, freq):
    """Pure-JAX (lax.conv) reference mirroring the PyTorch Sequential."""
    B, H, T = x.shape
    K1, P1 = freq // 2, freq // 4
    K3, P3 = freq // 4, freq // 4
    dn = ("NCHW", "OIHW", "NCHW")

    def elu(v):
        return jnp.where(v > 0, v, jnp.exp(jnp.minimum(v, 0.0)) - 1.0)

    def bn(v, s, h):
        return v * s[None, :, None, None] + h[None, :, None, None]

    y = x[:, None, :, :].astype(F32)                               # (B,1,H,T)
    y = lax.conv_general_dilated(y, p["w1"].reshape(4, 1, 1, K1),
                                 (1, 1), ((0, 0), (P1, P1)), dimension_numbers=dn)
    y = bn(y, p["s1"], p["h1"])
    y = lax.conv_general_dilated(y, p["w2"].reshape(8, 1, H, 1),
                                 (1, 1), ((0, 0), (0, 0)), dimension_numbers=dn,
                                 feature_group_count=4)
    y = elu(bn(y + p["b2"][None, :, None, None], p["s2"], p["h2"]))
    w = (y.shape[-1] // 4) * 4
    y = y[..., :w].reshape(B, 8, 1, w // 4, 4).mean(-1)
    y = lax.conv_general_dilated(y, p["w3"].reshape(8, 1, 1, K3),
                                 (1, 1), ((0, 0), (P3, P3)), dimension_numbers=dn,
                                 feature_group_count=8)
    y = y + p["b3"][None, :, None, None]
    y = lax.conv_general_dilated(y, p["w4"].reshape(8, 8, 1, 1),
                                 (1, 1), ((0, 0), (0, 0)), dimension_numbers=dn)
    y = elu(bn(y + p["b4"][None, :, None, None], p["s3"], p["h3"]))
    w = (y.shape[-1] // 8) * 8
    y = y[..., :w].reshape(B, 8, 1, w // 8, 8).mean(-1)
    return jnp.squeeze(y)


if __name__ == "__main__":
    # Small shapes consistent with the module: args.n_channels=4, args.freq_time=16,
    # mod=0  =>  x: (batch=2, electrodes=4, time=16)
    B, H, T = 2, 4, 16
    freq = T

    key = jax.random.PRNGKey(0)
    kx, kp = jax.random.split(key)
    x = jax.random.normal(kx, (B, H, T), dtype=F32)
    params = init_params(kp, H, freq)

    use_bf16 = _default_bf16_matmul()
    out = eegnet4_forward(x, params, freq=freq, use_bf16_matmul=use_bf16)
    out = jax.block_until_ready(out)

    ref = reference_forward(x, params, freq=freq)
    assert out.shape == tuple(ref.shape) == (B, C2), (out.shape, ref.shape)
    atol, rtol = (3e-2, 3e-2) if use_bf16 else (1e-4, 1e-3)
    if not jnp.allclose(out, ref, atol=atol, rtol=rtol):
        raise AssertionError("Pallas kernel does not match JAX reference")
    print("KERNEL_OK")
</pallas_src>

<mosaic_0001>
module attributes {stable_mosaic.version = 11 : i64} {
  func.func @eegnet4_kernel(%arg0: i32, %arg1: memref<96x128xf32, #tpu.memory_space<vmem>>, %arg2: memref<136x96xf32, #tpu.memory_space<vmem>>, %arg3: memref<136x1xf32, #tpu.memory_space<vmem>>, %arg4: memref<72x136xf32, #tpu.memory_space<vmem>>, %arg5: memref<72x1xf32, #tpu.memory_space<vmem>>, %arg6: memref<8x72xf32, #tpu.memory_space<vmem>>, %arg7: memref<8x128xf32, #tpu.memory_space<vmem>>) attributes {dimension_semantics = [#tpu.dimension_semantics<parallel>], iteration_bounds = array<i64: 1>, scalar_prefetch = 0 : i64, scratch_operands = 0 : i64, tpu.core_type = #tpu.core_type<tc>, window_params = [{transform_indices = @transform_0, window_bounds = array<i64: 96, 128>}, {pipeline_mode = #tpu.pipeline_mode<synchronous>, transform_indices = @transform_1, window_bounds = array<i64: 136, 96>}, {pipeline_mode = #tpu.pipeline_mode<synchronous>, transform_indices = @transform_2, window_bounds = array<i64: 136, 1>}, {pipeline_mode = #tpu.pipeline_mode<synchronous>, transform_indices = @transform_3, window_bounds = array<i64: 72, 136>}, {pipeline_mode = #tpu.pipeline_mode<synchronous>, transform_indices = @transform_4, window_bounds = array<i64: 72, 1>}, {pipeline_mode = #tpu.pipeline_mode<synchronous>, transform_indices = @transform_5, window_bounds = array<i64: 8, 72>}, {transform_indices = @transform_6, window_bounds = array<i64: 8, 128>}]} {
    %c0 = arith.constant 0 : index
    %c0_0 = arith.constant 0 : index
    %0 = vector.load %arg2[%c0, %c0_0] : memref<136x96xf32, #tpu.memory_space<vmem>>, vector<136x96xf32>
    %c0_1 = arith.constant 0 : index
    %c0_2 = arith.constant 0 : index
    %1 = vector.load %arg1[%c0_1, %c0_2] : memref<96x128xf32, #tpu.memory_space<vmem>>, vector<96x128xf32>
    %cst = arith.constant dense<0.000000e+00> : vector<136x128xf32>
    %2 = tpu.matmul %0, %1, %cst {dimension_numbers = #tpu.dot_dimension_numbers<[1], [0], [0], [1], [0, 0, 1, 1], [], []>} : vector<136x96xf32>, vector<96x128xf32>, vector<136x128xf32> -> vector<136x128xf32>
    %c0_3 = arith.constant 0 : index
    %c0_4 = arith.constant 0 : index
    %3 = vector.load %arg3[%c0_3, %c0_4] : memref<136x1xf32, #tpu.memory_space<vmem>>, vector<136x1xf32>
    %4 = vector.broadcast %3 : vector<136x1xf32> to vector<136x128xf32>
    %5 = arith.addf %2, %4 : vector<136x128xf32>
    %cst_5 = arith.constant 0.000000e+00 : f32
    %6 = vector.broadcast %cst_5 : f32 to vector<136x128xf32>
    %7 = arith.cmpf ogt, %5, %6 : vector<136x128xf32>
    %cst_6 = arith.constant 0.000000e+00 : f32
    %8 = vector.broadcast %cst_6 : f32 to vector<136x128xf32>
    %9 = arith.minimumf %5, %8 : vector<136x128xf32>
    %10 = math.exp %9 : vector<136x128xf32>
    %cst_7 = arith.constant 1.000000e+00 : f32
    %11 = vector.broadcast %cst_7 : f32 to vector<136x128xf32>
    %12 = arith.subf %10, %11 : vector<136x128xf32>
    %13 = arith.select %7, %5, %12 : vector<136x128xi1>, vector<136x128xf32>
    %c0_8 = arith.constant 0 : index
    %c0_9 = arith.constant 0 : index
    %14 = vector.load %arg4[%c0_8, %c0_9] : memref<72x136xf32, #tpu.memory_space<vmem>>, vector<72x136xf32>
    %cst_10 = arith.constant dense<0.000000e+00> : vector<72x128xf32>
    %15 = tpu.matmul %14, %13, %cst_10 {dimension_numbers = #tpu.dot_dimension_numbers<[1], [0], [0], [1], [0, 0, 1, 1], [], []>} : vector<72x136xf32>, vector<136x128xf32>, vector<72x128xf32> -> vector<72x128xf32>
    %c0_11 = arith.constant 0 : index
    %c0_12 = arith.constant 0 : index
    %16 = vector.load %arg5[%c0_11, %c0_12] : memref<72x1xf32, #tpu.memory_space<vmem>>, vector<72x1xf32>
    %17 = vector.broadcast %16 : vector<72x1xf32> to vector<72x128xf32>
    %18 = arith.addf %15, %17 : vector<72x128xf32>
    %cst_13 = arith.constant 0.000000e+00 : f32
    %19 = vector.broadcast %cst_13 : f32 to vector<72x128xf32>
    %20 = arith.cmpf ogt, %18, %19 : vector<72x128xf32>
    %cst_14 = arith.constant 0.000000e+00 : f32
    %21 = vector.broadcast %cst_14 : f32 to vector<72x128xf32>
    %22 = arith.minimumf %18, %21 : vector<72x128xf32>
    %23 = math.exp %22 : vector<72x128xf32>
    %cst_15 = arith.constant 1.000000e+00 : f32
    %24 = vector.broadcast %cst_15 : f32 to vector<72x128xf32>
    %25 = arith.subf %23, %24 : vector<72x128xf32>
    %26 = arith.select %20, %18, %25 : vector<72x128xi1>, vector<72x128xf32>
    %c0_16 = arith.constant 0 : index
    %c0_17 = arith.constant 0 : index
    %27 = vector.load %arg6[%c0_16, %c0_17] : memref<8x72xf32, #tpu.memory_space<vmem>>, vector<8x72xf32>
    %cst_18 = arith.constant dense<0.000000e+00> : vector<8x128xf32>
    %28 = tpu.matmul %27, %26, %cst_18 {dimension_numbers = #tpu.dot_dimension_numbers<[1], [0], [0], [1], [0, 0, 1, 1], [], []>} : vector<8x72xf32>, vector<72x128xf32>, vector<8x128xf32> -> vector<8x128xf32>
    %c0_19 = arith.constant 0 : index
    %c0_20 = arith.constant 0 : index
    %29 = vector.load %arg7[%c0_19, %c0_20] : memref<8x128xf32, #tpu.memory_space<vmem>>, vector<8x128xf32>
    tpu.vector_store %arg7[%c0_19, %c0_20], %28 {strides = array<i32>} : memref<8x128xf32, #tpu.memory_space<vmem>>, vector<8x128xf32>,
    return
  }
  func.func @transform_0(%arg0: i32) -> (i32, i32) {
    %c0_i32 = arith.constant 0 : i32
    %c0_i32_0 = arith.constant 0 : i32
    return %c0_i32, %arg0 : i32, i32
  }
  func.func @transform_1(%arg0: i32) -> (i32, i32) {
    %c0_i32 = arith.constant 0 : i32
    %c0_i32_0 = arith.constant 0 : i32
    %c0_i32_1 = arith.constant 0 : i32
    return %c0_i32, %c0_i32_0 : i32, i32
  }
  func.func @transform_2(%arg0: i32) -> (i32, i32) {
    %c0_i32 = arith.constant 0 : i32
    %c0_i32_0 = arith.constant 0 : i32
    %c0_i32_1 = arith.constant 0 : i32
    return %c0_i32, %c0_i32_0 : i32, i32
  }
  func.func @transform_3(%arg0: i32) -> (i32, i32) {
    %c0_i32 = arith.constant 0 : i32
    %c0_i32_0 = arith.constant 0 : i32
    %c0_i32_1 = arith.constant 0 : i32
    return %c0_i32, %c0_i32_0 : i32, i32
  }
  func.func @transform_4(%arg0: i32) -> (i32, i32) {
    %c0_i32 = arith.constant 0 : i32
    %c0_i32_0 = arith.constant 0 : i32
    %c0_i32_1 = arith.constant 0 : i32
    return %c0_i32, %c0_i32_0 : i32, i32
  }
  func.func @transform_5(%arg0: i32) -> (i32, i32) {
    %c0_i32 = arith.constant 0 : i32
    %c0_i32_0 = arith.constant 0 : i32
    %c0_i32_1 = arith.constant 0 : i32
    return %c0_i32, %c0_i32_0 : i32, i32
  }
  func.func @transform_6(%arg0: i32) -> (i32, i32) {
    %c0_i32 = arith.constant 0 : i32
    %c0_i32_0 = arith.constant 0 : i32
    return %c0_i32, %arg0 : i32, i32
  }
}

module attributes {stable_mosaic.version = 11 : i64} {
  func.func @eegnet4_kernel(%arg0: i32, %arg1: memref<96x128xf32, #tpu.memory_space<vmem>>, %arg2: memref<136x96xf32, #tpu.memory_space<vmem>>, %arg3: memref<136x1xf32, #tpu.memory_space<vmem>>, %arg4: memref<72x136xf32, #tpu.memory_space<vmem>>, %arg5: memref<72x1xf32, #tpu.memory_space<vmem>>, %arg6: memref<8x72xf32, #tpu.memory_space<vmem>>, %arg7: memref<8x128xf32, #tpu.memory_space<vmem>>) attributes {dimension_semantics = [#tpu.dimension_semantics<parallel>], iteration_bounds = array<i64: 1>, scalar_prefetch = 0 : i64, scratch_operands = 0 : i64, tpu.core_type = #tpu.core_type<tc>, window_params = [{transform_indices = @transform_0, window_bounds = array<i64: 96, 128>}, {pipeline_mode = #tpu.pipeline_mode<synchronous>, transform_indices = @transform_1, window_bounds = array<i64: 136, 96>}, {pipeline_mode = #tpu.pipeline_mode<synchronous>, transform_indices = @transform_2, window_bounds = array<i64: 136, 1>}, {pipeline_mode = #tpu.pipeline_mode<synchronous>, transform_indices = @transform_3, window_bounds = array<i64: 72, 136>}, {pipeline_mode = #tpu.pipeline_mode<synchronous>, transform_indices = @transform_4, window_bounds = array<i64: 72, 1>}, {pipeline_mode = #tpu.pipeline_mode<synchronous>, transform_indices = @transform_5, window_bounds = array<i64: 8, 72>}, {transform_indices = @transform_6, window_bounds = array<i64: 8, 128>}]} {
    %c0 = arith.constant 0 : index
    %c0_0 = arith.constant 0 : index
    %0 = vector.load %arg2[%c0, %c0_0] : memref<136x96xf32, #tpu.memory_space<vmem>>, vector<136x96xf32>
    %c0_1 = arith.constant 0 : index
    %c0_2 = arith.constant 0 : index
    %1 = vector.load %arg1[%c0_1, %c0_2] : memref<96x128xf32, #tpu.memory_space<vmem>>, vector<96x128xf32>
    %cst = arith.constant dense<0.000000e+00> : vector<136x128xf32>
    %2 = tpu.matmul %0, %1, %cst {dimension_numbers = #tpu.dot_dimension_numbers<[1], [0], [0], [1], [0, 0, 1, 1], [], []>} : vector<136x96xf32>, vector<96x128xf32>, vector<136x128xf32> -> vector<136x128xf32>
    %c0_3 = arith.constant 0 : index
    %c0_4 = arith.constant 0 : index
    %3 = vector.load %arg3[%c0_3, %c0_4] : memref<136x1xf32, #tpu.memory_space<vmem>>, vector<136x1xf32>
    %4 = vector.broadcast %3 : vector<136x1xf32> to vector<136x128xf32>
    %5 = arith.addf %2, %4 : vector<136x128xf32>
    %cst_5 = arith.constant 0.000000e+00 : f32
    %6 = vector.broadcast %cst_5 : f32 to vector<136x128xf32>
    %7 = arith.cmpf ogt, %5, %6 : vector<136x128xf32>
    %cst_6 = arith.constant 0.000000e+00 : f32
    %8 = vector.broadcast %cst_6 : f32 to vector<136x128xf32>
    %9 = arith.minimumf %5, %8 : vector<136x128xf32>
    %10 = math.exp %9 : vector<136x128xf32>
    %cst_7 = arith.constant 1.000000e+00 : f32
    %11 = vector.broadcast %cst_7 : f32 to vector<136x128xf32>
    %12 = arith.subf %10, %11 : vector<136x128xf32>
    %13 = arith.select %7, %5, %12 : vector<136x128xi1>, vector<136x128xf32>
    %c0_8 = arith.constant 0 : index
    %c0_9 = arith.constant 0 : index
    %14 = vector.load %arg4[%c0_8, %c0_9] : memref<72x136xf32, #tpu.memory_space<vmem>>, vector<72x136xf32>
    %cst_10 = arith.constant dense<0.000000e+00> : vector<72x128xf32>
    %15 = tpu.matmul %14, %13, %cst_10 {dimension_numbers = #tpu.dot_dimension_numbers<[1], [0], [0], [1], [0, 0, 1, 1], [], []>} : vector<72x136xf32>, vector<136x128xf32>, vector<72x128xf32> -> vector<72x128xf32>
    %c0_11 = arith.constant 0 : index
    %c0_12 = arith.constant 0 : index
    %16 = vector.load %arg5[%c0_11, %c0_12] : memref<72x1xf32, #tpu.memory_space<vmem>>, vector<72x1xf32>
    %17 = vector.broadcast %16 : vector<72x1xf32> to vector<72x128xf32>
    %18 = arith.addf %15, %17 : vector<72x128xf32>
    %cst_13 = arith.constant 0.000000e+00 : f32
    %19 = vector.broadcast %cst_13 : f32 to vector<72x128xf32>
    %20 = arith.cmpf ogt, %18, %19 : vector<72x128xf32>
    %cst_14 = arith.constant 0.000000e+00 : f32
    %21 = vector.broadcast %cst_14 : f32 to vector<72x128xf32>
    %22 = arith.minimumf %18, %21 : vector<72x128xf32>
    %23 = math.exp %22 : vector<72x128xf32>
    %cst_15 = arith.constant 1.000000e+00 : f32
    %24 = vector.broadcast %cst_15 : f32 to vector<72x128xf32>
    %25 = arith.subf %23, %24 : vector<72x128xf32>
    %26 = arith.select %20, %18, %25 : vector<72x128xi1>, vector<72x128xf32>
    %c0_16 = arith.constant 0 : index
    %c0_17 = arith.constant 0 : index
    %27 = vector.load %arg6[%c0_16, %c0_17] : memref<8x72xf32, #tpu.memory_space<vmem>>, vector<8x72xf32>
    %cst_18 = arith.constant dense<0.000000e+00> : vector<8x128xf32>
    %28 = tpu.matmul %27, %26, %cst_18 {dimension_numbers = #tpu.dot_dimension_numbers<[1], [0], [0], [1], [0, 0, 1, 1], [], []>} : vector<8x72xf32>, vector<72x128xf32>, vector<8x128xf32> -> vector<8x128xf32>
    %c0_19 = arith.constant 0 : index
    %c0_20 = arith.constant 0 : index
    %29 = vector.load %arg7[%c0_19, %c0_20] : memref<8x128xf32, #tpu.memory_space<vmem>>, vector<8x128xf32>
    tpu.vector_store %arg7[%c0_19, %c0_20], %28 {strides = array<i32>} : memref<8x128xf32, #tpu.memory_space<vmem>>, vector<8x128xf32>,
    return
  }
  func.func @transform_0(%arg0: i32) -> (i32, i32) {
    %c0_i32 = arith.constant 0 : i32
    %c0_i32_0 = arith.constant 0 : i32
    return %c0_i32, %arg0 : i32, i32
  }
  func.func @transform_1(%arg0: i32) -> (i32, i32) {
    %c0_i32 = arith.constant 0 : i32
    %c0_i32_0 = arith.constant 0 : i32
    %c0_i32_1 = arith.constant 0 : i32
    return %c0_i32, %c0_i32_0 : i32, i32
  }
  func.func @transform_2(%arg0: i32) -> (i32, i32) {
    %c0_i32 = arith.constant 0 : i32
    %c0_i32_0 = arith.constant 0 : i32
    %c0_i32_1 = arith.constant 0 : i32
    return %c0_i32, %c0_i32_0 : i32, i32
  }
  func.func @transform_3(%arg0: i32) -> (i32, i32) {
    %c0_i32 = arith.constant 0 : i32
    %c0_i32_0 = arith.constant 0 : i32
    %c0_i32_1 = arith.constant 0 : i32
    return %c0_i32, %c0_i32_0 : i32, i32
  }
  func.func @transform_4(%arg0: i32) -> (i32, i32) {
    %c0_i32 = arith.constant 0 : i32
    %c0_i32_0 = arith.constant 0 : i32
    %c0_i32_1 = arith.constant 0 : i32
    return %c0_i32, %c0_i32_0 : i32, i32
  }
  func.func @transform_5(%arg0: i32) -> (i32, i32) {
    %c0_i32 = arith.constant 0 : i32
    %c0_i32_0 = arith.constant 0 : i32
    %c0_i32_1 = arith.constant 0 : i32
    return %c0_i32, %c0_i32_0 : i32, i32
  }
  func.func @transform_6(%arg0: i32) -> (i32, i32) {
    %c0_i32 = arith.constant 0 : i32
    %c0_i32_0 = arith.constant 0 : i32
    return %c0_i32, %arg0 : i32, i32
  }
}

</mosaic_0001>

<bundles_post_ra>
// kernel: tpu_custom_call.1
= control target key start
LH: loop header
LB: loop body
LE: loop exit
PB: predicated region body
PF: predicated region fallthrough
CT: control target
= control target key end

     0   :  { %v1138_v3 = vmov 0.0|0.0   ;;  %vm1139_vm0 = vmmov 0   ;;  %v1140_v6 = vmov 0.0   ;;  %v1141_v7 = vmov 0   ;;  %s1519_s0 = inlined_call_operand.vmem [shape: f32[96,128], index: 0, kind: input, shape index: {}]   ;;  %s1520_s1 = inlined_call_operand.vmem [shape: f32[136,96], index: 1, kind: input, shape index: {}]   ;;  %s1521_s2 = inlined_call_operand.vmem [shape: f32[136,1], index: 2, kind: input, shape index: {}]   ;;  %s1522_s3 = inlined_call_operand.vmem [shape: f32[72,136], index: 3, kind: input, shape index: {}]   ;;  %s1523_s4 = inlined_call_operand.vmem [shape: f32[72,1], index: 4, kind: input, shape index: {}]   ;;  %s1524_s5 = inlined_call_operand.vmem [shape: f32[8,72], index: 5, kind: input, shape index: {}]   ;;  %s1525_s6 = inlined_call_operand.hbm [shape: f32[8,128], index: 6, kind: output, shape index: {}]  }
   0x1   :  { %v41_v0 = vld [vmem:[%s1519_s0] sm:$0xff]  ;;  %v42_v1 = vld [vmem:[%s1519_s0 + $0x8] sm:$0xff]  ;;  %v43_v2 = vld [vmem:[%s1519_s0 + $0x10] sm:$0xff]  ;;  %1001 = vmatprep.subr.bf16.mxu0 %v1138_v3  ;;  %929 = vmatprep.mubr.msk.f32.mxu0 %vm1139_vm0, %v1140_v6 }
   0x2   :  { %v1002_v4 = vpack.c.bf16 %v42_v1, %v41_v0  ;;  %v44_v5 = vld [vmem:[%s1519_s0 + $0x18] sm:$0xff]  ;;  %1060 = vset.pattern.permute.xlu0 %v1141_v7  ;;  %1061 = vset.pattern.permute.xlu1 %v1141_v7  ;;  %v45_v9 = vld [vmem:[%s1519_s0 + $0x20] sm:$0xff]  ;;  %v46_v10 = vld [vmem:[%s1519_s0 + $0x28] sm:$0xff] }
   0x3   :  { %v1005_v8 = vpack.c.bf16 %v44_v5, %v43_v2  ;;  %1019 = vmatprep.subr.bf16.mxu1 %v1138_v3  ;;  %v1008_v11 = vpack.c.bf16 %v46_v10, %v45_v9  ;;  %v47_v12 = vld [vmem:[%s1519_s0 + $0x30] sm:$0xff]  ;;  %v48_v13 = vld [vmem:[%s1519_s0 + $0x38] sm:$0xff]  ;;  %v53_v14 = vld [vmem:[%s1521_s2] sm:$0xff] }
   0x4   :  { %1003 = vmatpush3.bf16.msra.mxu0 %v1002_v4  ;;  %72 = vperm.xlu0 %1060, %v53_v14   ;;  %v55_v15 = vld [vmem:[%s1521_s2 + $0x10] sm:$0xff]  ;;  %v1011_v16 = vpack.c.bf16 %v48_v13, %v47_v12  ;;  %v54_v17 = vld [vmem:[%s1521_s2 + $0x8] sm:$0xff]  ;;  %v49_v18 = vld [vmem:[%s1519_s0 + $0x40] sm:$0xff] }
   0x5   :  { %1004 = vmatprep.subr.bf16.mxu0 %v1138_v3  ;;  %82 = vperm.xlu1 %1061, %v55_v15   ;;  %v50_v19 = vld [vmem:[%s1519_s0 + $0x48] sm:$0xff]  ;;  %v56_v20 = vld [vmem:[%s1521_s2 + $0x18] sm:$0xff]  ;;  %v57_v22 = vld [vmem:[%s1521_s2 + $0x20] sm:$0xff] }
   0x6   :  { %v1014_v21 = vpack.c.bf16 %v50_v19, %v49_v18  ;;  %v51_v23 = vld [vmem:[%s1519_s0 + $0x50] sm:$0xff]  ;;  %v52_v24 = vld [vmem:[%s1519_s0 + $0x58] sm:$0xff]  ;;  %v58_v25 = vld [vmem:[%s1521_s2 + $0x28] sm:$0xff] }
   0x8   :  { %1006 = vmatpush3.bf16.msra.mxu0 %v1005_v8  ;;  %77 = vperm.xlu0 %1060, %v54_v17  }
   0x9   :  { %1007 = vmatprep.subr.bf16.mxu0 %v1138_v3  ;;  %87 = vperm.xlu1 %1061, %v56_v20  }
   0xc   :  { %1009 = vmatpush3.bf16.msra.mxu0 %v1008_v11  ;;  %92 = vperm.xlu0 %1060, %v57_v22  }
   0xd   :  { %1010 = vmatprep.subr.bf16.mxu0 %v1138_v3 }
  0x10   :  { %1012 = vmatpush3.bf16.msra.mxu0 %v1011_v16 }
  0x11   :  { %1013 = vmatprep.subr.bf16.mxu0 %v1138_v3 }
  0x12   :  { %11 = vsyncpa [#allocation3], 0  ;;  %v1017_v26 = vpack.c.bf16 %v52_v24, %v51_v23  ;;  %97 = vperm.xlu1 %1061, %v58_v25   ;;  %v59_v27 = vld [vmem:[%s1521_s2 + $0x30] sm:$0xff]  ;;  %v60_v28 = vld [vmem:[%s1521_s2 + $0x38] sm:$0xff]  ;;  %vm155_vm1 = vcmask 785408   ;;  %vm531_vm2 = vcmask 64512  }
  0x13   :  { %102 = vperm.xlu0 %1060, %v59_v27   ;;  %v24_v29 = vld [vmem:[%s1520_s1] sm:$0xff]  ;;  %v62_v31 = vld [vmem:[%s1521_s2 + $0x48] sm:$0xff]  ;;  %v63_v33 = vld [vmem:[%s1521_s2 + $0x50] sm:$0xff]  ;;  %s1142_s0 = smov [#allocation2]  }
  0x14   :  { %1015 = vmatpush3.bf16.msra.mxu0 %v1014_v21  ;;  %v61_v30 = vld [vmem:[%s1521_s2 + $0x40] sm:$0xff]  ;;  %v25_v32 = vld [vmem:[%s1520_s1 + $0x8] sm:$0xff]  ;;  %v64_v34 = vld [vmem:[%s1521_s2 + $0x58] sm:$0xff]  ;;  %s805_s13 = sshll.u32 %s1142_s0, 4  ;;  %s806_s13 = int_to_ptr.vmem [resolvable:$true] %s805_s13 }
  0x15   :  { %1016 = vmatprep.subr.bf16.mxu0 %v1138_v3  ;;  %v26_v35 = vld [vmem:[%s1520_s1 + $0x10] sm:$0xff]  ;;  %v65_v36 = vld [vmem:[%s1521_s2 + $0x60] sm:$0xff]  ;;  %v66_v37 = vld [vmem:[%s1521_s2 + $0x68] sm:$0xff]  ;;  %s1114_s14 = scalar_lea.vmem %s806_s13, 128  ;;  %p1119_p1 = scmp.lt.s32.totalorder %s806_s13, %s806_s13 }
  0x16   :  { %107 = vperm.xlu1 %1061, %v60_v28   ;;  %v27_v38 = vld [vmem:[%s1520_s1 + $0x18] sm:$0xff]  ;;  %v67_v39 = vld [vmem:[%s1521_s2 + $0x70] sm:$0xff]  ;;  %v28_v41 = vld [vmem:[%s1520_s1 + $0x20] sm:$0xff]  ;;  %p1115_p0 = scmp.ne.s32.totalorder %s806_s13, %s1114_s14  ;;  %p1120_p2 = scmp.lt.s32.totalorder %s1114_s14, %s1114_s14 }
  0x17   :  { %112 = vperm.xlu0 %1060, %v61_v30   ;;  %v68_v40 = vld [vmem:[%s1521_s2 + $0x78] sm:$0xff]  ;;  %v69_v42 = vld [vmem:[%s1521_s2 + $0x80] sm:$0xff]  ;;  %v29_v44 = vld [vmem:[%s1520_s1 + $0x28] sm:$0xff] }
  0x18   :  { %1018 = vmatpush3.bf16.msra.mxu0 %v1017_v26  ;;  %v477_v43 = vld [vmem:[%s1523_s4] sm:$0xff]  ;;  %v478_v45 = vld [vmem:[%s1523_s4 + $0x8] sm:$0xff]  ;;  %v479_v46 = vld [vmem:[%s1523_s4 + $0x10] sm:$0xff]  ;;  %p1121_p3 = por %p1120_p2, %p1119_p1 }
  0x19   :  { %v30_v47 = vld [vmem:[%s1520_s1 + $0x30] sm:$0xff]  ;;  %v480_v48 = vld [vmem:[%s1523_s4 + $0x18] sm:$0xff]  ;;  %v481_v49 = vld [vmem:[%s1523_s4 + $0x20] sm:$0xff] }
  0x1a   :  { %117 = vperm.xlu1 %1061, %v62_v31   ;;  %v31_v50 = vld [vmem:[%s1520_s1 + $0x38] sm:$0xff]  ;;  %v482_v51 = vld [vmem:[%s1523_s4 + $0x28] sm:$0xff]  ;;  %v483_v52 = vld [vmem:[%s1523_s4 + $0x30] sm:$0xff]  ;;  %p1122_p4 = pnand %p1121_p3, %p1115_p0 }
  0x1b   :  { %930 = vmatmul.mubr.msk.f32.vlgmr.msra.gmra.mrb[0].mxu0 %vm155_vm1, %v24_v29  ;;  %122 = vperm.xlu0 %1060, %v63_v33   ;;  %v32_v53 = vld [vmem:[%s1520_s1 + $0x40] sm:$0xff]  ;;  %v484_v54 = vld [vmem:[%s1523_s4 + $0x38] sm:$0xff]  ;;  %v33_v56 = vld [vmem:[%s1520_s1 + $0x48] sm:$0xff] }
  0x1c   :  { %932 = vmatprep.mubr.msk.f32.mxu0 %vm1139_vm0, %v1140_v6  ;;  %v485_v55 = vld [vmem:[%s1523_s4 + $0x40] sm:$0xff]  ;;  %v34_v57 = vld [vmem:[%s1520_s1 + $0x50] sm:$0xff]  ;;  %v35_v58 = vld [vmem:[%s1520_s1 + $0x58] sm:$0xff] }
  0x1d   :  { %v36_v59 = vld [vmem:[%s1520_s1 + $0x60] sm:$0xff]  ;;  %v37_v60 = vld [vmem:[%s1520_s1 + $0x68] sm:$0xff]  ;;  %v38_v61 = vld [vmem:[%s1520_s1 + $0x70] sm:$0xff] }
  0x1e   :  { %127 = vperm.xlu1 %1061, %v64_v34   ;;  %v39_v62 = vld [vmem:[%s1520_s1 + $0x78] sm:$0xff]  ;;  %v40_v63 = vld [vmem:[%s1520_s1 + $0x80] sm:$0xff]  ;;  %v460_v0 = vld [vmem:[%s1522_s3 + $0x8] sm:$0xff] }
  0x1f   :  { %933 = vmatmul.mubr.msk.f32.gmra.mrb[2].mxu0 %vm155_vm1, %v25_v32  ;;  %132 = vperm.xlu0 %1060, %v65_v36  }
  0x20   :  { %935 = vmatprep.mubr.msk.f32.mxu0 %vm1139_vm0, %v1140_v6  ;;  %847 = vmatprep.mubr.msk.f32.mxu1 %vm531_vm2, %v460_v0 }
  0x22   :  { %137 = vperm.xlu1 %1061, %v66_v37  }
  0x23   :  { %936 = vmatmul.mubr.msk.f32.gmra.mrb[4].mxu0 %vm155_vm1, %v26_v35  ;;  %142 = vperm.xlu0 %1060, %v67_v39  }
  0x24   :  { %938 = vmatprep.mubr.msk.f32.mxu0 %vm1139_vm0, %v1140_v6 }
  0x26   :  { %147 = vperm.xlu1 %1061, %v68_v40  }
  0x27   :  { %939 = vmatmul.mubr.msk.f32.gmra.mrb[6].mxu0 %vm155_vm1, %v27_v38  ;;  %152 = vperm.xlu0 %1060, %v69_v42  }
  0x28   :  { %941 = vmatprep.mubr.msk.f32.mxu0 %vm1139_vm0, %v1140_v6 }
  0x2a   :  { %488 = vperm.xlu1 %1061, %v477_v43  }
  0x2b   :  { %942 = vmatmul.mubr.msk.f32.gmra.mrb[8].mxu0 %vm155_vm1, %v28_v41  ;;  %493 = vperm.xlu0 %1060, %v478_v45  }
  0x2c   :  { %944 = vmatprep.mubr.msk.f32.mxu0 %vm1139_vm0, %v1140_v6 }
  0x2e   :  { %498 = vperm.xlu1 %1061, %v479_v46  }
  0x2f   :  { %945 = vmatmul.mubr.msk.f32.gmra.mrb[10].mxu0 %vm155_vm1, %v29_v44  ;;  %503 = vperm.xlu0 %1060, %v480_v48  }
  0x30   :  { %947 = vmatprep.mubr.msk.f32.mxu0 %vm1139_vm0, %v1140_v6 }
  0x32   :  { %508 = vperm.xlu1 %1061, %v481_v49  }
  0x33   :  { %948 = vmatmul.mubr.msk.f32.gmra.mrb[12].mxu0 %vm155_vm1, %v30_v47  ;;  %513 = vperm.xlu0 %1060, %v482_v51  }
  0x34   :  { %950 = vmatprep.mubr.msk.f32.mxu0 %vm1139_vm0, %v1140_v6 }
  0x36   :  { %518 = vperm.xlu1 %1061, %v483_v52  }
  0x37   :  { %951 = vmatmul.mubr.msk.f32.gmra.mrb[14].mxu0 %vm155_vm1, %v31_v50  ;;  %523 = vperm.xlu0 %1060, %v484_v54  }
  0x38   :  { %953 = vmatprep.mubr.msk.f32.mxu0 %vm1139_vm0, %v1140_v6 }
  0x3a   :  { %528 = vperm.xlu1 %1061, %v485_v55  }
  0x3b   :  { %954 = vmatmul.mubr.msk.f32.gmra.mrb[16].mxu0 %vm155_vm1, %v32_v53 }
  0x3c   :  { %956 = vmatprep.mubr.msk.f32.mxu0 %vm1139_vm0, %v1140_v6 }
  0x3f   :  { %957 = vmatmul.mubr.msk.f32.gmra.mrb[18].mxu0 %vm155_vm1, %v33_v56 }
  0x40   :  { %959 = vmatprep.mubr.msk.f32.mxu0 %vm1139_vm0, %v1140_v6 }
  0x43   :  { %960 = vmatmul.mubr.msk.f32.gmra.mrb[20].mxu0 %vm155_vm1, %v34_v57 }
  0x44   :  { %962 = vmatprep.mubr.msk.f32.mxu0 %vm1139_vm0, %v1140_v6 }
  0x47   :  { %963 = vmatmul.mubr.msk.f32.gmra.mrb[22].mxu0 %vm155_vm1, %v35_v58 }
  0x48   :  { %965 = vmatprep.mubr.msk.f32.mxu0 %vm1139_vm0, %v1140_v6 }
  0x4b   :  { %966 = vmatmul.mubr.msk.f32.gmra.mrb[24].mxu0 %vm155_vm1, %v36_v59 }
  0x4c   :  { %968 = vmatprep.mubr.msk.f32.mxu0 %vm1139_vm0, %v1140_v6 }
  0x4f   :  { %969 = vmatmul.mubr.msk.f32.gmra.mrb[26].mxu0 %vm155_vm1, %v37_v60 }
  0x50   :  { %971 = vmatprep.mubr.msk.f32.mxu0 %vm1139_vm0, %v1140_v6 }
  0x53   :  { %972 = vmatmul.mubr.msk.f32.gmra.mrb[28].mxu0 %vm155_vm1, %v38_v61 }
  0x54   :  { %974 = vmatprep.mubr.msk.f32.mxu0 %vm1139_vm0, %v1140_v6 }
  0x57   :  { %975 = vmatmul.mubr.msk.f32.gmra.mrb[30].mxu0 %vm155_vm1, %v39_v62 }
  0x58   :  { %977 = vmatprep.mubr.msk.f32.mxu0 %vm1139_vm0, %v1140_v6 }
  0x5b   :  { %978 = vmatmul.mubr.msk.f32.gmra.mrb[32].mxu0 %vm155_vm1, %v40_v63 }
  0x83   :  { %v73_v1 = vpop.permute.xlu0 %72 }
  0x84   :  { %v83_v13 = vpop.permute.xlu1 %82 }
  0x87   :  { %v78_v8 = vpop.permute.xlu0 %77 }
  0x88   :  { %v88_v20 = vpop.permute.xlu1 %87 }
  0x8b   :  { %v93_v26 = vpop.permute.xlu0 %92 }
  0x91   :  { %v98_v33 = vpop.permute.xlu1 %97 }
  0x92   :  { %v103_v42 = vpop.permute.xlu0 %102 }
  0x95   :  { %v108_v52 = vpop.permute.xlu1 %107 }
  0x96   :  { %v113_v61 = vpop.permute.xlu0 %112 }
  0xee   :  { %v273_v2 = vpop.f32.mrb[0].mxu0 }
  0xef   :  { %v274_v4 = vadd.f32 %v273_v2, %v73_v1  ;;  %v931_v5 = vpop.f32.mrb[1].mxu0 }
  0xf1   :  { %v374_v7 = vmin.f32 %v274_v4, 0.0  ;;  %vm357_vm3 = vcmp.gt.f32.partialorder %v274_v4, 0.0 }
  0xf2   :  { %v278_v9 = vpop.f32.mrb[2].mxu0 }
  0xf3   :  { %v391_v10 = vmul.f32 1.442695, %v374_v7  ;;  %v279_v11 = vadd.f32 %v278_v9, %v78_v8  ;;  %v934_v12 = vpop.f32.mrb[3].mxu0  ;;  %v118_v9 = vpop.permute.xlu1 %117 }
  0xf5   :  { %1062 = vpow2.f32 %v391_v10  ;;  %v375_v14 = vmin.f32 %v279_v11, 0.0  ;;  %vm358_vm4 = vcmp.gt.f32.partialorder %v279_v11, 0.0 }
  0xf6   :  { %v283_v15 = vpop.f32.mrb[4].mxu0 }
  0xf7   :  { %v393_v16 = vmul.f32 1.442695, %v375_v14  ;;  %v284_v17 = vadd.f32 %v283_v15, %v83_v13  ;;  %v937_v18 = vpop.f32.mrb[5].mxu0 }
  0xf8   :  { %v123_v18 = vpop.permute.xlu0 %122 }
  0xf9   :  { %1064 = vpow2.f32 %v393_v16  ;;  %v376_v19 = vmin.f32 %v284_v17, 0.0  ;;  %vm359_vm5 = vcmp.gt.f32.partialorder %v284_v17, 0.0 }
  0xfa   :  { %v288_v21 = vpop.f32.mrb[6].mxu0 }
  0xfb   :  { %v395_v22 = vmul.f32 1.442695, %v376_v19  ;;  %v289_v23 = vadd.f32 %v288_v21, %v88_v20  ;;  %v940_v24 = vpop.f32.mrb[7].mxu0 }
  0xfd   :  { %1066 = vpow2.f32 %v395_v22  ;;  %v377_v25 = vmin.f32 %v289_v23, 0.0  ;;  %vm360_vm6 = vcmp.gt.f32.partialorder %v289_v23, 0.0 }
  0xfe   :  { %v293_v27 = vpop.f32.mrb[8].mxu0 }
  0xff   :  { %v1063_v28 = vpop.eup %1062  ;;  %v397_v29 = vmul.f32 1.442695, %v377_v25  ;;  %v1405_v30 = vadd.f32 %v293_v27, %v93_v26  ;;  %v943_v31 = vpop.f32.mrb[9].mxu0 }
 0x100   :  { %v830_v35 = vadd.f32 -1.0, %v1063_v28  ;;  %v128_v28 = vpop.permute.xlu1 %127 }
 0x101   :  { %1068 = vpow2.f32 %v397_v29  ;;  %v378_v32 = vmin.f32 %v1405_v30, 0.0  ;;  %vm361_vm7 = vcmp.gt.f32.partialorder %v1405_v30, 0.0 }
 0x102   :  { %v298_v34 = vpop.f32.mrb[10].mxu0  ;;  %v442_v44 = vsel %vm357_vm3, %v274_v4, %v830_v35 }
 0x103   :  { %v1065_v36 = vpop.eup %1064  ;;  %v399_v37 = vmul.f32 1.442695, %v378_v32  ;;  %v299_v38 = vadd.f32 %v298_v34, %v98_v33  ;;  %v946_v39 = vpop.f32.mrb[11].mxu0 }
 0x104   :  { %v831_v40 = vadd.f32 -1.0, %v1065_v36 }
 0x105   :  { %1070 = vpow2.f32 %v399_v37  ;;  %v379_v41 = vmin.f32 %v299_v38, 0.0  ;;  %vm362_vm8 = vcmp.gt.f32.partialorder %v299_v38, 0.0  ;;  %v133_v37 = vpop.permute.xlu0 %132 }
 0x106   :  { %v303_v43 = vpop.f32.mrb[12].mxu0  ;;  %v443_v45 = vsel %vm358_vm4, %v279_v11, %v831_v40 }
 0x107   :  { %v1067_v46 = vpop.eup %1066  ;;  %v401_v47 = vmul.f32 1.442695, %v379_v41  ;;  %v1408_v48 = vadd.f32 %v303_v43, %v103_v42  ;;  %v949_v49 = vpop.f32.mrb[13].mxu0  ;;  %v1020_v50 = vpack.c.bf16 %v443_v45, %v442_v44 }
 0x108   :  { %v832_v53 = vadd.f32 -1.0, %v1067_v46 }
 0x109   :  { %1072 = vpow2.f32 %v401_v47  ;;  %v380_v51 = vmin.f32 %v1408_v48, 0.0  ;;  %1021 = vmatpush1.bf16.msra.mxu1 %v1020_v50  ;;  %vm363_vm9 = vcmp.gt.f32.partialorder %v1408_v48, 0.0  ;;  %v138_v47 = vpop.permute.xlu1 %137 }
 0x10a   :  { %v308_v54 = vpop.f32.mrb[14].mxu0  ;;  %1022 = vmatprep.subr.bf16.mxu1 %v1138_v3  ;;  %v444_v63 = vsel %vm359_vm5, %v284_v17, %v832_v53 }
 0x10b   :  { %v1069_v55 = vpop.eup %1068  ;;  %v403_v56 = vmul.f32 1.442695, %v380_v51  ;;  %v309_v57 = vadd.f32 %v308_v54, %v108_v52  ;;  %v952_v58 = vpop.f32.mrb[15].mxu0 }
 0x10c   :  { %v833_v59 = vadd.f32 -1.0, %v1069_v55 }
 0x10d   :  { %1074 = vpow2.f32 %v403_v56  ;;  %v381_v60 = vmin.f32 %v309_v57, 0.0  ;;  %vm364_vm10 = vcmp.gt.f32.partialorder %v309_v57, 0.0  ;;  %v143_v56 = vpop.permute.xlu0 %142 }
 0x10e   :  { %v313_v62 = vpop.f32.mrb[16].mxu0  ;;  %v445_v0 = vsel %vm360_vm6, %v289_v23, %v833_v59 }
 0x10f   :  { %v1071_v1 = vpop.eup %1070  ;;  %v405_v2 = vmul.f32 1.442695, %v381_v60  ;;  %v1412_v4 = vadd.f32 %v313_v62, %v113_v61  ;;  %v955_v5 = vpop.f32.mrb[17].mxu0  ;;  %v1023_v7 = vpack.c.bf16 %v445_v0, %v444_v63 }
 0x110   :  { %v834_v10 = vadd.f32 -1.0, %v1071_v1 }
 0x111   :  { %1076 = vpow2.f32 %v405_v2  ;;  %v382_v8 = vmin.f32 %v1412_v4, 0.0  ;;  %1024 = vmatpush1.bf16.msra.mxu1 %v1023_v7  ;;  %vm365_vm11 = vcmp.gt.f32.partialorder %v1412_v4, 0.0  ;;  %v148_v2 = vpop.permute.xlu1 %147 }
 0x112   :  { %v318_v11 = vpop.f32.mrb[18].mxu0  ;;  %1025 = vmatprep.subr.bf16.mxu1 %v1138_v3  ;;  %v446_v20 = vsel %vm361_vm7, %v1405_v30, %v834_v10 }
 0x113   :  { %v1073_v12 = vpop.eup %1072  ;;  %v407_v13 = vmul.f32 1.442695, %v382_v8  ;;  %v319_v14 = vadd.f32 %v318_v11, %v118_v9  ;;  %v958_v15 = vpop.f32.mrb[19].mxu0 }
 0x114   :  { %v835_v16 = vadd.f32 -1.0, %v1073_v12 }
 0x115   :  { %1078 = vpow2.f32 %v407_v13  ;;  %v383_v17 = vmin.f32 %v319_v14, 0.0  ;;  %vm366_vm12 = vcmp.gt.f32.partialorder %v319_v14, 0.0  ;;  %v153_v13 = vpop.permute.xlu0 %152 }
 0x116   :  { %v323_v19 = vpop.f32.mrb[20].mxu0  ;;  %v447_v21 = vsel %vm362_vm8, %v299_v38, %v835_v16 }
 0x117   :  { %v1075_v22 = vpop.eup %1074  ;;  %v409_v23 = vmul.f32 1.442695, %v383_v17  ;;  %v1418_v24 = vadd.f32 %v323_v19, %v123_v18  ;;  %v961_v25 = vpop.f32.mrb[21].mxu0  ;;  %v1026_v26 = vpack.c.bf16 %v447_v21, %v446_v20 }
 0x118   :  { %v836_v29 = vadd.f32 -1.0, %v1075_v22 }
 0x119   :  { %1080 = vpow2.f32 %v409_v23  ;;  %v384_v27 = vmin.f32 %v1418_v24, 0.0  ;;  %1027 = vmatpush1.bf16.msra.mxu1 %v1026_v26  ;;  %vm367_vm13 = vcmp.gt.f32.partialorder %v1418_v24, 0.0 }
 0x11a   :  { %v328_v31 = vpop.f32.mrb[22].mxu0  ;;  %1028 = vmatprep.subr.bf16.mxu1 %v1138_v3  ;;  %v448_v39 = vsel %vm363_vm9, %v1408_v48, %v836_v29 }
 0x11b   :  { %v1077_v32 = vpop.eup %1076  ;;  %v411_v33 = vmul.f32 1.442695, %v384_v27  ;;  %v329_v34 = vadd.f32 %v328_v31, %v128_v28  ;;  %v964_v30 = vpop.f32.mrb[23].mxu0 }
 0x11c   :  { %v837_v35 = vadd.f32 -1.0, %v1077_v32 }
 0x11d   :  { %1082 = vpow2.f32 %v411_v33  ;;  %v385_v36 = vmin.f32 %v329_v34, 0.0  ;;  %vm368_vm14 = vcmp.gt.f32.partialorder %v329_v34, 0.0 }
 0x11e   :  { %v333_v38 = vpop.f32.mrb[24].mxu0  ;;  %v449_v40 = vsel %vm364_vm10, %v309_v57, %v837_v35 }
 0x11f   :  { %v1079_v41 = vpop.eup %1078  ;;  %v413_v42 = vmul.f32 1.442695, %v385_v36  ;;  %v1424_v43 = vadd.f32 %v333_v38, %v133_v37  ;;  %v967_v44 = vpop.f32.mrb[25].mxu0  ;;  %v1029_v45 = vpack.c.bf16 %v449_v40, %v448_v39  ;;  %v459_v39 = vld [vmem:[%s1522_s3] sm:$0xff] }
 0x120   :  { %v838_v49 = vadd.f32 -1.0, %v1079_v41  ;;  %v462_v41 = vld [vmem:[%s1522_s3 + $0x18] sm:$0xff]  ;;  %v463_v44 = vld [vmem:[%s1522_s3 + $0x20] sm:$0xff] }
 0x121   :  { %1084 = vpow2.f32 %v413_v42  ;;  %v386_v46 = vmin.f32 %v1424_v43, 0.0  ;;  %1030 = vmatpush1.bf16.msra.mxu1 %v1029_v45  ;;  %vm369_vm15 = vcmp.gt.f32.partialorder %v1424_v43, 0.0  ;;  %v461_v42 = vld [vmem:[%s1522_s3 + $0x10] sm:$0xff]  ;;  %v466_v45 = vld [vmem:[%s1522_s3 + $0x38] sm:$0xff] }
 0x122   :  { %v338_v50 = vpop.f32.mrb[26].mxu0  ;;  %1031 = vmatprep.subr.bf16.mxu1 %v1138_v3  ;;  %v450_v58 = vsel %vm365_vm11, %v1412_v4, %v838_v49  ;;  %v467_v49 = vld [vmem:[%s1522_s3 + $0x40] sm:$0xff] }
 0x123   :  { %v1081_v51 = vpop.eup %1080  ;;  %v415_v52 = vmul.f32 1.442695, %v386_v46  ;;  %v339_v53 = vadd.f32 %v338_v50, %v138_v47  ;;  %v970_v48 = vpop.f32.mrb[27].mxu0  ;;  %v465_v46 = vld [vmem:[%s1522_s3 + $0x30] sm:$0xff]  ;;  %v468_v47 = vld [vmem:[%s1522_s3 + $0x48] sm:$0xff]  ;;  %v470_v50 = vld [vmem:[%s1522_s3 + $0x58] sm:$0xff] }
 0x124   :  { %v839_v54 = vadd.f32 -1.0, %v1081_v51  ;;  %v469_v51 = vld [vmem:[%s1522_s3 + $0x50] sm:$0xff]  ;;  %v474_v48 = vld [vmem:[%s1522_s3 + $0x78] sm:$0xff] }
 0x125   :  { %1086 = vpow2.f32 %v415_v52  ;;  %v387_v55 = vmin.f32 %v339_v53, 0.0  ;;  %vm370_vm1 = vcmp.gt.f32.partialorder %v339_v53, 0.0  ;;  %v472_v52 = vld [vmem:[%s1522_s3 + $0x68] sm:$0xff] }
 0x126   :  { %v343_v57 = vpop.f32.mrb[28].mxu0  ;;  %v451_v59 = vsel %vm366_vm12, %v319_v14, %v839_v54  ;;  %v473_v54 = vld [vmem:[%s1522_s3 + $0x70] sm:$0xff] }
 0x127   :  { %v1083_v60 = vpop.eup %1082  ;;  %v417_v61 = vmul.f32 1.442695, %v387_v55  ;;  %v344_v62 = vadd.f32 %v343_v57, %v143_v56  ;;  %v973_v63 = vpop.f32.mrb[29].mxu0  ;;  %v1032_v0 = vpack.c.bf16 %v451_v59, %v450_v58  ;;  %v476_v55 = vld [vmem:[%s1522_s3 + $0x88] sm:$0xff]  ;;  %v475_v56 = vld [vmem:[%s1522_s3 + $0x80] sm:$0xff] }
 0x128   :  { %v840_v5 = vadd.f32 -1.0, %v1083_v60  ;;  %v489_v57 = vpop.permute.xlu1 %488 }
 0x129   :  { %1088 = vpow2.f32 %v417_v61  ;;  %v388_v1 = vmin.f32 %v344_v62, 0.0  ;;  %1033 = vmatpush1.bf16.msra.mxu1 %v1032_v0  ;;  %vm371_vm3 = vcmp.gt.f32.partialorder %v344_v62, 0.0 }
 0x12a   :  { %v348_v7 = vpop.f32.mrb[30].mxu0  ;;  %1034 = vmatprep.subr.bf16.mxu1 %v1138_v3  ;;  %v452_v15 = vsel %vm367_vm13, %v1418_v24, %v840_v5  ;;  %vm724_vm13 = vcmask 588800  }
 0x12b   :  { %v1085_v8 = vpop.eup %1084  ;;  %v419_v9 = vmul.f32 1.442695, %v388_v1  ;;  %v349_v10 = vadd.f32 %v348_v7, %v148_v2  ;;  %v976_v11 = vpop.f32.mrb[31].mxu0 }
 0x12c   :  { %v841_v12 = vadd.f32 -1.0, %v1085_v8  ;;  %v499_v7 = vpop.permute.xlu1 %498 }
 0x12d   :  { %1090 = vpow2.f32 %v419_v9  ;;  %v389_v4 = vmin.f32 %v349_v10, 0.0  ;;  %vm372_vm4 = vcmp.gt.f32.partialorder %v349_v10, 0.0 }
 0x12e   :  { %v353_v14 = vpop.f32.mrb[32].mxu0  ;;  %v453_v16 = vsel %vm368_vm14, %v329_v34, %v841_v12 }
 0x12f   :  { %v1087_v17 = vpop.eup %1086  ;;  %v421_v18 = vmul.f32 1.442695, %v389_v4  ;;  %v354_v19 = vadd.f32 %v353_v14, %v153_v13  ;;  %v979_v20 = vpop.f32.mrb[33].mxu0  ;;  %v1035_v21 = vpack.c.bf16 %v453_v16, %v452_v15 }
 0x130   :  { %v842_v23 = vadd.f32 -1.0, %v1087_v17 }
 0x131   :  { %1092 = vpow2.f32 %v421_v18  ;;  %v390_v22 = vmin.f32 %v354_v19, 0.0  ;;  %1036 = vmatpush1.bf16.msra.mxu1 %v1035_v21  ;;  %vm373_vm5 = vcmp.gt.f32.partialorder %v354_v19, 0.0  ;;  %v509_v18 = vpop.permute.xlu1 %508 }
 0x132   :  { %1037 = vmatprep.subr.bf16.mxu1 %v1138_v3  ;;  %v454_v24 = vsel %vm369_vm15, %v1424_v43, %v842_v23  ;;  %v464_v43 = vld [vmem:[%s1522_s3 + $0x28] sm:$0xff] }
 0x133   :  { %v1089_v25 = vpop.eup %1088  ;;  %v423_v26 = vmul.f32 1.442695, %v390_v22 }
 0x134   :  { %v843_v27 = vadd.f32 -1.0, %v1089_v25 }
 0x135   :  { %1094 = vpow2.f32 %v423_v26 }
 0x136   :  { %v455_v28 = vsel %vm370_vm1, %v339_v53, %v843_v27  ;;  %v471_v53 = vld [vmem:[%s1522_s3 + $0x60] sm:$0xff] }
 0x137   :  { %v1091_v29 = vpop.eup %1090  ;;  %v1038_v31 = vpack.c.bf16 %v455_v28, %v454_v24 }
 0x138   :  { %v844_v32 = vadd.f32 -1.0, %v1091_v29 }
 0x139   :  { %1039 = vmatpush1.bf16.msra.mxu1 %v1038_v31 }
 0x13a   :  { %1040 = vmatprep.subr.bf16.mxu1 %v1138_v3  ;;  %v456_v30 = vsel %vm371_vm3, %v344_v62, %v844_v32  ;;  %v494_v62 = vpop.permute.xlu0 %493 }
 0x13b   :  { %v1093_v33 = vpop.eup %1092 }
 0x13c   :  { %v845_v34 = vadd.f32 -1.0, %v1093_v33 }
 0x13e   :  { %v457_v35 = vsel %vm372_vm4, %v349_v10, %v845_v34  ;;  %v504_v4 = vpop.permute.xlu0 %503 }
 0x13f   :  { %v1095_v36 = vpop.eup %1094  ;;  %v1041_v37 = vpack.c.bf16 %v457_v35, %v456_v30  ;;  %v519_v30 = vpop.permute.xlu1 %518 }
 0x140   :  { %v846_v38 = vadd.f32 -1.0, %v1095_v36 }
 0x141   :  { %1042 = vmatpush1.bf16.msra.mxu1 %v1041_v37 }
 0x142   :  { %591 = vmatprep.subr.mxu1 %v1140_v6  ;;  %v458_v40 = vsel %vm373_vm5, %v354_v19, %v846_v38  ;;  %v514_v26 = vpop.permute.xlu0 %513 }
 0x145   :  { %592 = vmatpush1.msra.mxu1 %v458_v40 }
 0x146   :  { %624 = vmatmul.mubr.f32.vlgmr.msra.gmra.mrb[0].mxu1 %v459_v39  ;;  %1043 = vmatprep.subr.bf16.mxu1 %v1138_v3 }
 0x147   :  { %848 = vmatprep.mubr.msk.f32.mxu1 %vm531_vm2, %v462_v41 }
 0x14a   :  { %629 = vmatmul.mubr.f32.gmra.mrb[2].mxu1 %v461_v42 }
 0x14b   :  { %849 = vmatprep.mubr.msk.f32.mxu1 %vm531_vm2, %v464_v43 }
 0x14e   :  { %634 = vmatmul.mubr.f32.gmra.mrb[4].mxu1 %v463_v44  ;;  %v524_v44 = vpop.permute.xlu0 %523 }
 0x14f   :  { %850 = vmatprep.mubr.msk.f32.mxu1 %vm531_vm2, %v466_v45 }
 0x152   :  { %639 = vmatmul.mubr.f32.gmra.mrb[6].mxu1 %v465_v46 }
 0x153   :  { %851 = vmatprep.mubr.msk.f32.mxu1 %vm531_vm2, %v468_v47 }
 0x156   :  { %644 = vmatmul.mubr.f32.gmra.mrb[8].mxu1 %v467_v49 }
 0x157   :  { %852 = vmatprep.mubr.msk.f32.mxu1 %vm531_vm2, %v470_v50 }
 0x15a   :  { %649 = vmatmul.mubr.f32.gmra.mrb[10].mxu1 %v469_v51 }
 0x15b   :  { %853 = vmatprep.mubr.msk.f32.mxu1 %vm531_vm2, %v472_v52 }
 0x15e   :  { %654 = vmatmul.mubr.f32.gmra.mrb[12].mxu1 %v471_v53 }
 0x15f   :  { %854 = vmatprep.mubr.msk.f32.mxu1 %vm531_vm2, %v474_v48  ;;  %v529_v48 = vpop.permute.xlu1 %528 }
 0x162   :  { %659 = vmatmul.mubr.f32.gmra.mrb[14].mxu1 %v473_v54 }
 0x163   :  { %855 = vmatprep.mubr.msk.f32.mxu1 %vm531_vm2, %v476_v55 }
 0x166   :  { %664 = vmatmul.mubr.f32.gmra.mrb[16].mxu1 %v475_v56 }
 0x167   :  { %998 = vmatprep.mubr.msk.f32.mxu1 %vm1139_vm0, %v1140_v6 }
 0x219   :  { %v625_v58 = vpop.f32.mrb[0].mxu1 }
 0x21a   :  { %v626_v59 = vadd.f32 %v625_v58, %v489_v57  ;;  %v627_v60 = vpop.f32.mrb[1].mxu1 }
 0x21c   :  { %v678_v61 = vmin.f32 %v626_v59, 0.0  ;;  %vm669_vm0 = vcmp.gt.f32.partialorder %v626_v59, 0.0 }
 0x21d   :  { %v630_v63 = vpop.f32.mrb[2].mxu1 }
 0x21e   :  { %v687_v0 = vmul.f32 1.442695, %v678_v61  ;;  %v631_v1 = vadd.f32 %v630_v63, %v494_v62  ;;  %v632_v2 = vpop.f32.mrb[3].mxu1 }
 0x220   :  { %1096 = vpow2.f32 %v687_v0  ;;  %v679_v5 = vmin.f32 %v631_v1, 0.0  ;;  %vm670_vm2 = vcmp.gt.f32.partialorder %v631_v1, 0.0 }
 0x221   :  { %v635_v8 = vpop.f32.mrb[4].mxu1 }
 0x222   :  { %v689_v9 = vmul.f32 1.442695, %v679_v5  ;;  %v636_v10 = vadd.f32 %v635_v8, %v499_v7  ;;  %v637_v11 = vpop.f32.mrb[5].mxu1 }
 0x224   :  { %1098 = vpow2.f32 %v689_v9  ;;  %v680_v12 = vmin.f32 %v636_v10, 0.0  ;;  %vm671_vm6 = vcmp.gt.f32.partialorder %v636_v10, 0.0 }
 0x225   :  { %v640_v13 = vpop.f32.mrb[6].mxu1 }
 0x226   :  { %v691_v14 = vmul.f32 1.442695, %v680_v12  ;;  %v641_v15 = vadd.f32 %v640_v13, %v504_v4  ;;  %v642_v16 = vpop.f32.mrb[7].mxu1 }
 0x228   :  { %1100 = vpow2.f32 %v691_v14  ;;  %v681_v17 = vmin.f32 %v641_v15, 0.0  ;;  %vm672_vm7 = vcmp.gt.f32.partialorder %v641_v15, 0.0 }
 0x229   :  { %v645_v19 = vpop.f32.mrb[8].mxu1 }
 0x22a   :  { %v1097_v20 = vpop.eup %1096  ;;  %v693_v21 = vmul.f32 1.442695, %v681_v17  ;;  %v646_v22 = vadd.f32 %v645_v19, %v509_v18  ;;  %v647_v23 = vpop.f32.mrb[9].mxu1  ;;  %v723_v17 = vld [vmem:[%s1524_s5] sm:$0xff] }
 0x22b   :  { %v856_v27 = vadd.f32 -1.0, %v1097_v20 }
 0x22c   :  { %1102 = vpow2.f32 %v693_v21  ;;  %v682_v25 = vmin.f32 %v646_v22, 0.0  ;;  %vm673_vm8 = vcmp.gt.f32.partialorder %v646_v22, 0.0 }
 0x22d   :  { %v650_v24 = vpop.f32.mrb[10].mxu1  ;;  %v714_v35 = vsel %vm669_vm0, %v626_v59, %v856_v27 }
 0x22e   :  { %v1099_v28 = vpop.eup %1098  ;;  %v695_v29 = vmul.f32 1.442695, %v682_v25  ;;  %v651_v31 = vadd.f32 %v650_v24, %v514_v26  ;;  %v652_v32 = vpop.f32.mrb[11].mxu1 }
 0x22f   :  { %v857_v33 = vadd.f32 -1.0, %v1099_v28 }
 0x230   :  { %1104 = vpow2.f32 %v695_v29  ;;  %v683_v34 = vmin.f32 %v651_v31, 0.0  ;;  %vm674_vm9 = vcmp.gt.f32.partialorder %v651_v31, 0.0 }
 0x231   :  { %v715_v36 = vsel %vm670_vm2, %v631_v1, %v857_v33  ;;  %v655_v37 = vpop.f32.mrb[12].mxu1 }
 0x232   :  { %v1101_v38 = vpop.eup %1100  ;;  %v1044_v39 = vpack.c.bf16 %v715_v36, %v714_v35  ;;  %v697_v40 = vmul.f32 1.442695, %v683_v34  ;;  %v656_v41 = vadd.f32 %v655_v37, %v519_v30  ;;  %v657_v42 = vpop.f32.mrb[13].mxu1 }
 0x233   :  { %v858_v45 = vadd.f32 -1.0, %v1101_v38 }
 0x234   :  { %1106 = vpow2.f32 %v697_v40  ;;  %v684_v43 = vmin.f32 %v656_v41, 0.0  ;;  %1045 = vmatpush3.bf16.msra.mxu1 %v1044_v39  ;;  %vm675_vm10 = vcmp.gt.f32.partialorder %v656_v41, 0.0 }
 0x235   :  { %v660_v46 = vpop.f32.mrb[14].mxu1  ;;  %1046 = vmatprep.subr.bf16.mxu1 %v1138_v3  ;;  %v716_v54 = vsel %vm671_vm6, %v636_v10, %v858_v45 }
 0x236   :  { %v1103_v47 = vpop.eup %1102  ;;  %v699_v49 = vmul.f32 1.442695, %v684_v43  ;;  %v661_v50 = vadd.f32 %v660_v46, %v524_v44  ;;  %v662_v51 = vpop.f32.mrb[15].mxu1 }
 0x237   :  { %v859_v52 = vadd.f32 -1.0, %v1103_v47 }
 0x238   :  { %1108 = vpow2.f32 %v699_v49  ;;  %v685_v53 = vmin.f32 %v661_v50, 0.0  ;;  %vm676_vm11 = vcmp.gt.f32.partialorder %v661_v50, 0.0 }
 0x239   :  { %v717_v55 = vsel %vm672_vm7, %v641_v15, %v859_v52  ;;  %v665_v56 = vpop.f32.mrb[16].mxu1 }
 0x23a   :  { %v1105_v57 = vpop.eup %1104  ;;  %v1047_v58 = vpack.c.bf16 %v717_v55, %v716_v54  ;;  %v701_v59 = vmul.f32 1.442695, %v685_v53  ;;  %v666_v60 = vadd.f32 %v665_v56, %v529_v48  ;;  %v667_v61 = vpop.f32.mrb[17].mxu1 }
 0x23b   :  { %v860_v63 = vadd.f32 -1.0, %v1105_v57 }
 0x23c   :  { %1110 = vpow2.f32 %v701_v59  ;;  %v686_v62 = vmin.f32 %v666_v60, 0.0  ;;  %1048 = vmatpush3.bf16.msra.mxu1 %v1047_v58  ;;  %vm677_vm12 = vcmp.gt.f32.partialorder %v666_v60, 0.0 }
 0x23d   :  { %1049 = vmatprep.subr.bf16.mxu1 %v1138_v3  ;;  %v718_v5 = vsel %vm673_vm8, %v646_v22, %v860_v63 }
 0x23e   :  { %v1107_v0 = vpop.eup %1106  ;;  %v703_v1 = vmul.f32 1.442695, %v686_v62 }
 0x23f   :  { %v861_v2 = vadd.f32 -1.0, %v1107_v0 }
 0x240   :  { %1112 = vpow2.f32 %v703_v1 }
 0x241   :  { %v719_v7 = vsel %vm674_vm9, %v651_v31, %v861_v2 }
 0x242   :  { %v1109_v8 = vpop.eup %1108  ;;  %v1050_v9 = vpack.c.bf16 %v719_v7, %v718_v5 }
 0x243   :  { %v862_v10 = vadd.f32 -1.0, %v1109_v8 }
 0x244   :  { %1051 = vmatpush3.bf16.msra.mxu1 %v1050_v9 }
 0x245   :  { %1052 = vmatprep.subr.bf16.mxu1 %v1138_v3  ;;  %v720_v4 = vsel %vm675_vm10, %v656_v41, %v862_v10 }
 0x246   :  { %v1111_v11 = vpop.eup %1110 }
 0x247   :  { %v863_v12 = vadd.f32 -1.0, %v1111_v11 }
 0x249   :  { %v721_v13 = vsel %vm676_vm11, %v661_v50, %v863_v12 }
 0x24a   :  { %v1113_v14 = vpop.eup %1112  ;;  %v1053_v15 = vpack.c.bf16 %v721_v13, %v720_v4 }
 0x24b   :  { %v864_v16 = vadd.f32 -1.0, %v1113_v14 }
 0x24c   :  { %1054 = vmatpush3.bf16.msra.mxu1 %v1053_v15 }
 0x24d   :  { %996 = vmatprep.subr.mxu1 %v1140_v6  ;;  %v722_v18 = vsel %vm677_vm12, %v666_v60, %v864_v16 }
 0x250   :  { %997 = vmatpush3.msra.mxu1 %v722_v18 }
 0x251   :  { %999 = vmatmul.mubr.msk.f32.vlgmr.msra.gmra.mrb[18].mxu1 %vm724_vm13, %v723_v17 }
 0x324   :  { %v794_v3 = vpop.f32.mrb[18].mxu1 }
 0x325   :  { %798 = vst [vmem:[#allocation2] sm:$0xff] %v794_v3  ;;  %v1000_v19 = vpop.f32.mrb[19].mxu1 }
 0x326   :  { %1125 = shalt.err (!%p1122_p4)
}
 0x327   :  { %s1126_s5 = scalar_lea.hbm %s1525_s6, 128 }
 0x328   :  { %p1127_p5 = scmp.ne.s32.totalorder %s1525_s6, %s1126_s5  ;;  %p1130_p6 = scmp.lt.u32.totalorder %s1126_s5, %s1525_s6 }
 0x32a   :  { %p1132_p7 = pnand %p1130_p6, %p1127_p5 }
 0x32c   :  { %1135 = shalt.err (!%p1132_p7)
}
 0x32d   :  { %808 = dma.vmem_to_hbm [thread:$0]  %s806_s13, 128, %s1525_s6, [#allocation3]  }
 0x32e   :  { %1136 = dma.done.wait [#allocation3], 128  }
 0x32f   :  { %1137 = vsyncadd [#allocation3], 4294967168 }
 0x330   :  { %812 = vsyncpa [#allocation3], 1 }

// kernel: tpu_custom_call.1
= control target key start
LH: loop header
LB: loop body
LE: loop exit
PB: predicated region body
PF: predicated region fallthrough
CT: control target
= control target key end

     0   :  { %v1138_v3 = vmov 0.0|0.0   ;;  %vm1139_vm0 = vmmov 0   ;;  %v1140_v6 = vmov 0.0   ;;  %v1141_v7 = vmov 0   ;;  %s1519_s0 = inlined_call_operand.vmem [shape: f32[96,128], index: 0, kind: input, shape index: {}]   ;;  %s1520_s1 = inlined_call_operand.vmem [shape: f32[136,96], index: 1, kind: input, shape index: {}]   ;;  %s1521_s2 = inlined_call_operand.vmem [shape: f32[136,1], index: 2, kind: input, shape index: {}]   ;;  %s1522_s3 = inlined_call_operand.vmem [shape: f32[72,136], index: 3, kind: input, shape index: {}]   ;;  %s1523_s4 = inlined_call_operand.vmem [shape: f32[72,1], index: 4, kind: input, shape index: {}]   ;;  %s1524_s5 = inlined_call_operand.vmem [shape: f32[8,72], index: 5, kind: input, shape index: {}]   ;;  %s1525_s6 = inlined_call_operand.hbm [shape: f32[8,128], index: 6, kind: output, shape index: {}]  }
   0x1   :  { %v41_v0 = vld [vmem:[%s1519_s0] sm:$0xff]  ;;  %v42_v1 = vld [vmem:[%s1519_s0 + $0x8] sm:$0xff]  ;;  %v43_v2 = vld [vmem:[%s1519_s0 + $0x10] sm:$0xff]  ;;  %1001 = vmatprep.subr.bf16.mxu0 %v1138_v3  ;;  %929 = vmatprep.mubr.msk.f32.mxu0 %vm1139_vm0, %v1140_v6 }
   0x2   :  { %v1002_v4 = vpack.c.bf16 %v42_v1, %v41_v0  ;;  %v44_v5 = vld [vmem:[%s1519_s0 + $0x18] sm:$0xff]  ;;  %1060 = vset.pattern.permute.xlu0 %v1141_v7  ;;  %1061 = vset.pattern.permute.xlu1 %v1141_v7  ;;  %v45_v9 = vld [vmem:[%s1519_s0 + $0x20] sm:$0xff]  ;;  %v46_v10 = vld [vmem:[%s1519_s0 + $0x28] sm:$0xff] }
   0x3   :  { %v1005_v8 = vpack.c.bf16 %v44_v5, %v43_v2  ;;  %1019 = vmatprep.subr.bf16.mxu1 %v1138_v3  ;;  %v1008_v11 = vpack.c.bf16 %v46_v10, %v45_v9  ;;  %v47_v12 = vld [vmem:[%s1519_s0 + $0x30] sm:$0xff]  ;;  %v48_v13 = vld [vmem:[%s1519_s0 + $0x38] sm:$0xff]  ;;  %v53_v14 = vld [vmem:[%s1521_s2] sm:$0xff] }
   0x4   :  { %1003 = vmatpush3.bf16.msra.mxu0 %v1002_v4  ;;  %72 = vperm.xlu0 %1060, %v53_v14   ;;  %v55_v15 = vld [vmem:[%s1521_s2 + $0x10] sm:$0xff]  ;;  %v1011_v16 = vpack.c.bf16 %v48_v13, %v47_v12  ;;  %v54_v17 = vld [vmem:[%s1521_s2 + $0x8] sm:$0xff]  ;;  %v49_v18 = vld [vmem:[%s1519_s0 + $0x40] sm:$0xff] }
   0x5   :  { %1004 = vmatprep.subr.bf16.mxu0 %v1138_v3  ;;  %82 = vperm.xlu1 %1061, %v55_v15   ;;  %v50_v19 = vld [vmem:[%s1519_s0 + $0x48] sm:$0xff]  ;;  %v56_v20 = vld [vmem:[%s1521_s2 + $0x18] sm:$0xff]  ;;  %v57_v22 = vld [vmem:[%s1521_s2 + $0x20] sm:$0xff] }
   0x6   :  { %v1014_v21 = vpack.c.bf16 %v50_v19, %v49_v18  ;;  %v51_v23 = vld [vmem:[%s1519_s0 + $0x50] sm:$0xff]  ;;  %v52_v24 = vld [vmem:[%s1519_s0 + $0x58] sm:$0xff]  ;;  %v58_v25 = vld [vmem:[%s1521_s2 + $0x28] sm:$0xff] }
   0x8   :  { %1006 = vmatpush3.bf16.msra.mxu0 %v1005_v8  ;;  %77 = vperm.xlu0 %1060, %v54_v17  }
   0x9   :  { %1007 = vmatprep.subr.bf16.mxu0 %v1138_v3  ;;  %87 = vperm.xlu1 %1061, %v56_v20  }
   0xc   :  { %1009 = vmatpush3.bf16.msra.mxu0 %v1008_v11  ;;  %92 = vperm.xlu0 %1060, %v57_v22  }
   0xd   :  { %1010 = vmatprep.subr.bf16.mxu0 %v1138_v3 }
  0x10   :  { %1012 = vmatpush3.bf16.msra.mxu0 %v1011_v16 }
  0x11   :  { %1013 = vmatprep.subr.bf16.mxu0 %v1138_v3 }
  0x12   :  { %11 = vsyncpa [#allocation3], 0  ;;  %v1017_v26 = vpack.c.bf16 %v52_v24, %v51_v23  ;;  %97 = vperm.xlu1 %1061, %v58_v25   ;;  %v59_v27 = vld [vmem:[%s1521_s2 + $0x30] sm:$0xff]  ;;  %v60_v28 = vld [vmem:[%s1521_s2 + $0x38] sm:$0xff]  ;;  %vm155_vm1 = vcmask 785408   ;;  %vm531_vm2 = vcmask 64512  }
  0x13   :  { %102 = vperm.xlu0 %1060, %v59_v27   ;;  %v24_v29 = vld [vmem:[%s1520_s1] sm:$0xff]  ;;  %v62_v31 = vld [vmem:[%s1521_s2 + $0x48] sm:$0xff]  ;;  %v63_v33 = vld [vmem:[%s1521_s2 + $0x50] sm:$0xff]  ;;  %s1142_s0 = smov [#allocation2]  }
  0x14   :  { %1015 = vmatpush3.bf16.msra.mxu0 %v1014_v21  ;;  %v61_v30 = vld [vmem:[%s1521_s2 + $0x40] sm:$0xff]  ;;  %v25_v32 = vld [vmem:[%s1520_s1 + $0x8] sm:$0xff]  ;;  %v64_v34 = vld [vmem:[%s1521_s2 + $0x58] sm:$0xff]  ;;  %s805_s13 = sshll.u32 %s1142_s0, 4  ;;  %s806_s13 = int_to_ptr.vmem [resolvable:$true] %s805_s13 }
  0x15   :  { %1016 = vmatprep.subr.bf16.mxu0 %v1138_v3  ;;  %v26_v35 = vld [vmem:[%s1520_s1 + $0x10] sm:$0xff]  ;;  %v65_v36 = vld [vmem:[%s1521_s2 + $0x60] sm:$0xff]  ;;  %v66_v37 = vld [vmem:[%s1521_s2 + $0x68] sm:$0xff]  ;;  %s1114_s14 = scalar_lea.vmem %s806_s13, 128  ;;  %p1119_p1 = scmp.lt.s32.totalorder %s806_s13, %s806_s13 }
  0x16   :  { %107 = vperm.xlu1 %1061, %v60_v28   ;;  %v27_v38 = vld [vmem:[%s1520_s1 + $0x18] sm:$0xff]  ;;  %v67_v39 = vld [vmem:[%s1521_s2 + $0x70] sm:$0xff]  ;;  %v28_v41 = vld [vmem:[%s1520_s1 + $0x20] sm:$0xff]  ;;  %p1115_p0 = scmp.ne.s32.totalorder %s806_s13, %s1114_s14  ;;  %p1120_p2 = scmp.lt.s32.totalorder %s1114_s14, %s1114_s14 }
  0x17   :  { %112 = vperm.xlu0 %1060, %v61_v30   ;;  %v68_v40 = vld [vmem:[%s1521_s2 + $0x78] sm:$0xff]  ;;  %v69_v42 = vld [vmem:[%s1521_s2 + $0x80] sm:$0xff]  ;;  %v29_v44 = vld [vmem:[%s1520_s1 + $0x28] sm:$0xff] }
  0x18   :  { %1018 = vmatpush3.bf16.msra.mxu0 %v1017_v26  ;;  %v477_v43 = vld [vmem:[%s1523_s4] sm:$0xff]  ;;  %v478_v45 = vld [vmem:[%s1523_s4 + $0x8] sm:$0xff]  ;;  %v479_v46 = vld [vmem:[%s1523_s4 + $0x10] sm:$0xff]  ;;  %p1121_p3 = por %p1120_p2, %p1119_p1 }
  0x19   :  { %v30_v47 = vld [vmem:[%s1520_s1 + $0x30] sm:$0xff]  ;;  %v480_v48 = vld [vmem:[%s1523_s4 + $0x18] sm:$0xff]  ;;  %v481_v49 = vld [vmem:[%s1523_s4 + $0x20] sm:$0xff] }
  0x1a   :  { %117 = vperm.xlu1 %1061, %v62_v31   ;;  %v31_v50 = vld [vmem:[%s1520_s1 + $0x38] sm:$0xff]  ;;  %v482_v51 = vld [vmem:[%s1523_s4 + $0x28] sm:$0xff]  ;;  %v483_v52 = vld [vmem:[%s1523_s4 + $0x30] sm:$0xff]  ;;  %p1122_p4 = pnand %p1121_p3, %p1115_p0 }
  0x1b   :  { %930 = vmatmul.mubr.msk.f32.vlgmr.msra.gmra.mrb[0].mxu0 %vm155_vm1, %v24_v29  ;;  %122 = vperm.xlu0 %1060, %v63_v33   ;;  %v32_v53 = vld [vmem:[%s1520_s1 + $0x40] sm:$0xff]  ;;  %v484_v54 = vld [vmem:[%s1523_s4 + $0x38] sm:$0xff]  ;;  %v33_v56 = vld [vmem:[%s1520_s1 + $0x48] sm:$0xff] }
  0x1c   :  { %932 = vmatprep.mubr.msk.f32.mxu0 %vm1139_vm0, %v1140_v6  ;;  %v485_v55 = vld [vmem:[%s1523_s4 + $0x40] sm:$0xff]  ;;  %v34_v57 = vld [vmem:[%s1520_s1 + $0x50] sm:$0xff]  ;;  %v35_v58 = vld [vmem:[%s1520_s1 + $0x58] sm:$0xff] }
  0x1d   :  { %v36_v59 = vld [vmem:[%s1520_s1 + $0x60] sm:$0xff]  ;;  %v37_v60 = vld [vmem:[%s1520_s1 + $0x68] sm:$0xff]  ;;  %v38_v61 = vld [vmem:[%s1520_s1 + $0x70] sm:$0xff] }
  0x1e   :  { %127 = vperm.xlu1 %1061, %v64_v34   ;;  %v39_v62 = vld [vmem:[%s1520_s1 + $0x78] sm:$0xff]  ;;  %v40_v63 = vld [vmem:[%s1520_s1 + $0x80] sm:$0xff]  ;;  %v460_v0 = vld [vmem:[%s1522_s3 + $0x8] sm:$0xff] }
  0x1f   :  { %933 = vmatmul.mubr.msk.f32.gmra.mrb[2].mxu0 %vm155_vm1, %v25_v32  ;;  %132 = vperm.xlu0 %1060, %v65_v36  }
  0x20   :  { %935 = vmatprep.mubr.msk.f32.mxu0 %vm1139_vm0, %v1140_v6  ;;  %847 = vmatprep.mubr.msk.f32.mxu1 %vm531_vm2, %v460_v0 }
  0x22   :  { %137 = vperm.xlu1 %1061, %v66_v37  }
  0x23   :  { %936 = vmatmul.mubr.msk.f32.gmra.mrb[4].mxu0 %vm155_vm1, %v26_v35  ;;  %142 = vperm.xlu0 %1060, %v67_v39  }
  0x24   :  { %938 = vmatprep.mubr.msk.f32.mxu0 %vm1139_vm0, %v1140_v6 }
  0x26   :  { %147 = vperm.xlu1 %1061, %v68_v40  }
  0x27   :  { %939 = vmatmul.mubr.msk.f32.gmra.mrb[6].mxu0 %vm155_vm1, %v27_v38  ;;  %152 = vperm.xlu0 %1060, %v69_v42  }
  0x28   :  { %941 = vmatprep.mubr.msk.f32.mxu0 %vm1139_vm0, %v1140_v6 }
  0x2a   :  { %488 = vperm.xlu1 %1061, %v477_v43  }
  0x2b   :  { %942 = vmatmul.mubr.msk.f32.gmra.mrb[8].mxu0 %vm155_vm1, %v28_v41  ;;  %493 = vperm.xlu0 %1060, %v478_v45  }
  0x2c   :  { %944 = vmatprep.mubr.msk.f32.mxu0 %vm1139_vm0, %v1140_v6 }
  0x2e   :  { %498 = vperm.xlu1 %1061, %v479_v46  }
  0x2f   :  { %945 = vmatmul.mubr.msk.f32.gmra.mrb[10].mxu0 %vm155_vm1, %v29_v44  ;;  %503 = vperm.xlu0 %1060, %v480_v48  }
  0x30   :  { %947 = vmatprep.mubr.msk.f32.mxu0 %vm1139_vm0, %v1140_v6 }
  0x32   :  { %508 = vperm.xlu1 %1061, %v481_v49  }
  0x33   :  { %948 = vmatmul.mubr.msk.f32.gmra.mrb[12].mxu0 %vm155_vm1, %v30_v47  ;;  %513 = vperm.xlu0 %1060, %v482_v51  }
  0x34   :  { %950 = vmatprep.mubr.msk.f32.mxu0 %vm1139_vm0, %v1140_v6 }
  0x36   :  { %518 = vperm.xlu1 %1061, %v483_v52  }
  0x37   :  { %951 = vmatmul.mubr.msk.f32.gmra.mrb[14].mxu0 %vm155_vm1, %v31_v50  ;;  %523 = vperm.xlu0 %1060, %v484_v54  }
  0x38   :  { %953 = vmatprep.mubr.msk.f32.mxu0 %vm1139_vm0, %v1140_v6 }
  0x3a   :  { %528 = vperm.xlu1 %1061, %v485_v55  }
  0x3b   :  { %954 = vmatmul.mubr.msk.f32.gmra.mrb[16].mxu0 %vm155_vm1, %v32_v53 }
  0x3c   :  { %956 = vmatprep.mubr.msk.f32.mxu0 %vm1139_vm0, %v1140_v6 }
  0x3f   :  { %957 = vmatmul.mubr.msk.f32.gmra.mrb[18].mxu0 %vm155_vm1, %v33_v56 }
  0x40   :  { %959 = vmatprep.mubr.msk.f32.mxu0 %vm1139_vm0, %v1140_v6 }
  0x43   :  { %960 = vmatmul.mubr.msk.f32.gmra.mrb[20].mxu0 %vm155_vm1, %v34_v57 }
  0x44   :  { %962 = vmatprep.mubr.msk.f32.mxu0 %vm1139_vm0, %v1140_v6 }
  0x47   :  { %963 = vmatmul.mubr.msk.f32.gmra.mrb[22].mxu0 %vm155_vm1, %v35_v58 }
  0x48   :  { %965 = vmatprep.mubr.msk.f32.mxu0 %vm1139_vm0, %v1140_v6 }
  0x4b   :  { %966 = vmatmul.mubr.msk.f32.gmra.mrb[24].mxu0 %vm155_vm1, %v36_v59 }
  0x4c   :  { %968 = vmatprep.mubr.msk.f32.mxu0 %vm1139_vm0, %v1140_v6 }
  0x4f   :  { %969 = vmatmul.mubr.msk.f32.gmra.mrb[26].mxu0 %vm155_vm1, %v37_v60 }
  0x50   :  { %971 = vmatprep.mubr.msk.f32.mxu0 %vm1139_vm0, %v1140_v6 }
  0x53   :  { %972 = vmatmul.mubr.msk.f32.gmra.mrb[28].mxu0 %vm155_vm1, %v38_v61 }
  0x54   :  { %974 = vmatprep.mubr.msk.f32.mxu0 %vm1139_vm0, %v1140_v6 }
  0x57   :  { %975 = vmatmul.mubr.msk.f32.gmra.mrb[30].mxu0 %vm155_vm1, %v39_v62 }
  0x58   :  { %977 = vmatprep.mubr.msk.f32.mxu0 %vm1139_vm0, %v1140_v6 }
  0x5b   :  { %978 = vmatmul.mubr.msk.f32.gmra.mrb[32].mxu0 %vm155_vm1, %v40_v63 }
  0x83   :  { %v73_v1 = vpop.permute.xlu0 %72 }
  0x84   :  { %v83_v13 = vpop.permute.xlu1 %82 }
  0x87   :  { %v78_v8 = vpop.permute.xlu0 %77 }
  0x88   :  { %v88_v20 = vpop.permute.xlu1 %87 }
  0x8b   :  { %v93_v26 = vpop.permute.xlu0 %92 }
  0x91   :  { %v98_v33 = vpop.permute.xlu1 %97 }
  0x92   :  { %v103_v42 = vpop.permute.xlu0 %102 }
  0x95   :  { %v108_v52 = vpop.permute.xlu1 %107 }
  0x96   :  { %v113_v61 = vpop.permute.xlu0 %112 }
  0xee   :  { %v273_v2 = vpop.f32.mrb[0].mxu0 }
  0xef   :  { %v274_v4 = vadd.f32 %v273_v2, %v73_v1  ;;  %v931_v5 = vpop.f32.mrb[1].mxu0 }
  0xf1   :  { %v374_v7 = vmin.f32 %v274_v4, 0.0  ;;  %vm357_vm3 = vcmp.gt.f32.partialorder %v274_v4, 0.0 }
  0xf2   :  { %v278_v9 = vpop.f32.mrb[2].mxu0 }
  0xf3   :  { %v391_v10 = vmul.f32 1.442695, %v374_v7  ;;  %v279_v11 = vadd.f32 %v278_v9, %v78_v8  ;;  %v934_v12 = vpop.f32.mrb[3].mxu0  ;;  %v118_v9 = vpop.permute.xlu1 %117 }
  0xf5   :  { %1062 = vpow2.f32 %v391_v10  ;;  %v375_v14 = vmin.f32 %v279_v11, 0.0  ;;  %vm358_vm4 = vcmp.gt.f32.partialorder %v279_v11, 0.0 }
  0xf6   :  { %v283_v15 = vpop.f32.mrb[4].mxu0 }
  0xf7   :  { %v393_v16 = vmul.f32 1.442695, %v375_v14  ;;  %v284_v17 = vadd.f32 %v283_v15, %v83_v13  ;;  %v937_v18 = vpop.f32.mrb[5].mxu0 }
  0xf8   :  { %v123_v18 = vpop.permute.xlu0 %122 }
  0xf9   :  { %1064 = vpow2.f32 %v393_v16  ;;  %v376_v19 = vmin.f32 %v284_v17, 0.0  ;;  %vm359_vm5 = vcmp.gt.f32.partialorder %v284_v17, 0.0 }
  0xfa   :  { %v288_v21 = vpop.f32.mrb[6].mxu0 }
  0xfb   :  { %v395_v22 = vmul.f32 1.442695, %v376_v19  ;;  %v289_v23 = vadd.f32 %v288_v21, %v88_v20  ;;  %v940_v24 = vpop.f32.mrb[7].mxu0 }
  0xfd   :  { %1066 = vpow2.f32 %v395_v22  ;;  %v377_v25 = vmin.f32 %v289_v23, 0.0  ;;  %vm360_vm6 = vcmp.gt.f32.partialorder %v289_v23, 0.0 }
  0xfe   :  { %v293_v27 = vpop.f32.mrb[8].mxu0 }
  0xff   :  { %v1063_v28 = vpop.eup %1062  ;;  %v397_v29 = vmul.f32 1.442695, %v377_v25  ;;  %v1405_v30 = vadd.f32 %v293_v27, %v93_v26  ;;  %v943_v31 = vpop.f32.mrb[9].mxu0 }
 0x100   :  { %v830_v35 = vadd.f32 -1.0, %v1063_v28  ;;  %v128_v28 = vpop.permute.xlu1 %127 }
 0x101   :  { %1068 = vpow2.f32 %v397_v29  ;;  %v378_v32 = vmin.f32 %v1405_v30, 0.0  ;;  %vm361_vm7 = vcmp.gt.f32.partialorder %v1405_v30, 0.0 }
 0x102   :  { %v298_v34 = vpop.f32.mrb[10].mxu0  ;;  %v442_v44 = vsel %vm357_vm3, %v274_v4, %v830_v35 }
 0x103   :  { %v1065_v36 = vpop.eup %1064  ;;  %v399_v37 = vmul.f32 1.442695, %v378_v32  ;;  %v299_v38 = vadd.f32 %v298_v34, %v98_v33  ;;  %v946_v39 = vpop.f32.mrb[11].mxu0 }
 0x104   :  { %v831_v40 = vadd.f32 -1.0, %v1065_v36 }
 0x105   :  { %1070 = vpow2.f32 %v399_v37  ;;  %v379_v41 = vmin.f32 %v299_v38, 0.0  ;;  %vm362_vm8 = vcmp.gt.f32.partialorder %v299_v38, 0.0  ;;  %v133_v37 = vpop.permute.xlu0 %132 }
 0x106   :  { %v303_v43 = vpop.f32.mrb[12].mxu0  ;;  %v443_v45 = vsel %vm358_vm4, %v279_v11, %v831_v40 }
 0x107   :  { %v1067_v46 = vpop.eup %1066  ;;  %v401_v47 = vmul.f32 1.442695, %v379_v41  ;;  %v1408_v48 = vadd.f32 %v303_v43, %v103_v42  ;;  %v949_v49 = vpop.f32.mrb[13].mxu0  ;;  %v1020_v50 = vpack.c.bf16 %v443_v45, %v442_v44 }
 0x108   :  { %v832_v53 = vadd.f32 -1.0, %v1067_v46 }
 0x109   :  { %1072 = vpow2.f32 %v401_v47  ;;  %v380_v51 = vmin.f32 %v1408_v48, 0.0  ;;  %1021 = vmatpush1.bf16.msra.mxu1 %v1020_v50  ;;  %vm363_vm9 = vcmp.gt.f32.partialorder %v1408_v48, 0.0  ;;  %v138_v47 = vpop.permute.xlu1 %137 }
 0x10a   :  { %v308_v54 = vpop.f32.mrb[14].mxu0  ;;  %1022 = vmatprep.subr.bf16.mxu1 %v1138_v3  ;;  %v444_v63 = vsel %vm359_vm5, %v284_v17, %v832_v53 }
 0x10b   :  { %v1069_v55 = vpop.eup %1068  ;;  %v403_v56 = vmul.f32 1.442695, %v380_v51  ;;  %v309_v57 = vadd.f32 %v308_v54, %v108_v52  ;;  %v952_v58 = vpop.f32.mrb[15].mxu0 }
 0x10c   :  { %v833_v59 = vadd.f32 -1.0, %v1069_v55 }
 0x10d   :  { %1074 = vpow2.f32 %v403_v56  ;;  %v381_v60 = vmin.f32 %v309_v57, 0.0  ;;  %vm364_vm10 = vcmp.gt.f32.partialorder %v309_v57, 0.0  ;;  %v143_v56 = vpop.permute.xlu0 %142 }
 0x10e   :  { %v313_v62 = vpop.f32.mrb[16].mxu0  ;;  %v445_v0 = vsel %vm360_vm6, %v289_v23, %v833_v59 }
 0x10f   :  { %v1071_v1 = vpop.eup %1070  ;;  %v405_v2 = vmul.f32 1.442695, %v381_v60  ;;  %v1412_v4 = vadd.f32 %v313_v62, %v113_v61  ;;  %v955_v5 = vpop.f32.mrb[17].mxu0  ;;  %v1023_v7 = vpack.c.bf16 %v445_v0, %v444_v63 }
 0x110   :  { %v834_v10 = vadd.f32 -1.0, %v1071_v1 }
 0x111   :  { %1076 = vpow2.f32 %v405_v2  ;;  %v382_v8 = vmin.f32 %v1412_v4, 0.0  ;;  %1024 = vmatpush1.bf16.msra.mxu1 %v1023_v7  ;;  %vm365_vm11 = vcmp.gt.f32.partialorder %v1412_v4, 0.0  ;;  %v148_v2 = vpop.permute.xlu1 %147 }
 0x112   :  { %v318_v11 = vpop.f32.mrb[18].mxu0  ;;  %1025 = vmatprep.subr.bf16.mxu1 %v1138_v3  ;;  %v446_v20 = vsel %vm361_vm7, %v1405_v30, %v834_v10 }
 0x113   :  { %v1073_v12 = vpop.eup %1072  ;;  %v407_v13 = vmul.f32 1.442695, %v382_v8  ;;  %v319_v14 = vadd.f32 %v318_v11, %v118_v9  ;;  %v958_v15 = vpop.f32.mrb[19].mxu0 }
 0x114   :  { %v835_v16 = vadd.f32 -1.0, %v1073_v12 }
 0x115   :  { %1078 = vpow2.f32 %v407_v13  ;;  %v383_v17 = vmin.f32 %v319_v14, 0.0  ;;  %vm366_vm12 = vcmp.gt.f32.partialorder %v319_v14, 0.0  ;;  %v153_v13 = vpop.permute.xlu0 %152 }
 0x116   :  { %v323_v19 = vpop.f32.mrb[20].mxu0  ;;  %v447_v21 = vsel %vm362_vm8, %v299_v38, %v835_v16 }
 0x117   :  { %v1075_v22 = vpop.eup %1074  ;;  %v409_v23 = vmul.f32 1.442695, %v383_v17  ;;  %v1418_v24 = vadd.f32 %v323_v19, %v123_v18  ;;  %v961_v25 = vpop.f32.mrb[21].mxu0  ;;  %v1026_v26 = vpack.c.bf16 %v447_v21, %v446_v20 }
 0x118   :  { %v836_v29 = vadd.f32 -1.0, %v1075_v22 }
 0x119   :  { %1080 = vpow2.f32 %v409_v23  ;;  %v384_v27 = vmin.f32 %v1418_v24, 0.0  ;;  %1027 = vmatpush1.bf16.msra.mxu1 %v1026_v26  ;;  %vm367_vm13 = vcmp.gt.f32.partialorder %v1418_v24, 0.0 }
 0x11a   :  { %v328_v31 = vpop.f32.mrb[22].mxu0  ;;  %1028 = vmatprep.subr.bf16.mxu1 %v1138_v3  ;;  %v448_v39 = vsel %vm363_vm9, %v1408_v48, %v836_v29 }
 0x11b   :  { %v1077_v32 = vpop.eup %1076  ;;  %v411_v33 = vmul.f32 1.442695, %v384_v27  ;;  %v329_v34 = vadd.f32 %v328_v31, %v128_v28  ;;  %v964_v30 = vpop.f32.mrb[23].mxu0 }
 0x11c   :  { %v837_v35 = vadd.f32 -1.0, %v1077_v32 }
 0x11d   :  { %1082 = vpow2.f32 %v411_v33  ;;  %v385_v36 = vmin.f32 %v329_v34, 0.0  ;;  %vm368_vm14 = vcmp.gt.f32.partialorder %v329_v34, 0.0 }
 0x11e   :  { %v333_v38 = vpop.f32.mrb[24].mxu0  ;;  %v449_v40 = vsel %vm364_vm10, %v309_v57, %v837_v35 }
 0x11f   :  { %v1079_v41 = vpop.eup %1078  ;;  %v413_v42 = vmul.f32 1.442695, %v385_v36  ;;  %v1424_v43 = vadd.f32 %v333_v38, %v133_v37  ;;  %v967_v44 = vpop.f32.mrb[25].mxu0  ;;  %v1029_v45 = vpack.c.bf16 %v449_v40, %v448_v39  ;;  %v459_v39 = vld [vmem:[%s1522_s3] sm:$0xff] }
 0x120   :  { %v838_v49 = vadd.f32 -1.0, %v1079_v41  ;;  %v462_v41 = vld [vmem:[%s1522_s3 + $0x18] sm:$0xff]  ;;  %v463_v44 = vld [vmem:[%s1522_s3 + $0x20] sm:$0xff] }
 0x121   :  { %1084 = vpow2.f32 %v413_v42  ;;  %v386_v46 = vmin.f32 %v1424_v43, 0.0  ;;  %1030 = vmatpush1.bf16.msra.mxu1 %v1029_v45  ;;  %vm369_vm15 = vcmp.gt.f32.partialorder %v1424_v43, 0.0  ;;  %v461_v42 = vld [vmem:[%s1522_s3 + $0x10] sm:$0xff]  ;;  %v466_v45 = vld [vmem:[%s1522_s3 + $0x38] sm:$0xff] }
 0x122   :  { %v338_v50 = vpop.f32.mrb[26].mxu0  ;;  %1031 = vmatprep.subr.bf16.mxu1 %v1138_v3  ;;  %v450_v58 = vsel %vm365_vm11, %v1412_v4, %v838_v49  ;;  %v467_v49 = vld [vmem:[%s1522_s3 + $0x40] sm:$0xff] }
 0x123   :  { %v1081_v51 = vpop.eup %1080  ;;  %v415_v52 = vmul.f32 1.442695, %v386_v46  ;;  %v339_v53 = vadd.f32 %v338_v50, %v138_v47  ;;  %v970_v48 = vpop.f32.mrb[27].mxu0  ;;  %v465_v46 = vld [vmem:[%s1522_s3 + $0x30] sm:$0xff]  ;;  %v468_v47 = vld [vmem:[%s1522_s3 + $0x48] sm:$0xff]  ;;  %v470_v50 = vld [vmem:[%s1522_s3 + $0x58] sm:$0xff] }
 0x124   :  { %v839_v54 = vadd.f32 -1.0, %v1081_v51  ;;  %v469_v51 = vld [vmem:[%s1522_s3 + $0x50] sm:$0xff]  ;;  %v474_v48 = vld [vmem:[%s1522_s3 + $0x78] sm:$0xff] }
 0x125   :  { %1086 = vpow2.f32 %v415_v52  ;;  %v387_v55 = vmin.f32 %v339_v53, 0.0  ;;  %vm370_vm1 = vcmp.gt.f32.partialorder %v339_v53, 0.0  ;;  %v472_v52 = vld [vmem:[%s1522_s3 + $0x68] sm:$0xff] }
 0x126   :  { %v343_v57 = vpop.f32.mrb[28].mxu0  ;;  %v451_v59 = vsel %vm366_vm12, %v319_v14, %v839_v54  ;;  %v473_v54 = vld [vmem:[%s1522_s3 + $0x70] sm:$0xff] }
 0x127   :  { %v1083_v60 = vpop.eup %1082  ;;  %v417_v61 = vmul.f32 1.442695, %v387_v55  ;;  %v344_v62 = vadd.f32 %v343_v57, %v143_v56  ;;  %v973_v63 = vpop.f32.mrb[29].mxu0  ;;  %v1032_v0 = vpack.c.bf16 %v451_v59, %v450_v58  ;;  %v476_v55 = vld [vmem:[%s1522_s3 + $0x88] sm:$0xff]  ;;  %v475_v56 = vld [vmem:[%s1522_s3 + $0x80] sm:$0xff] }
 0x128   :  { %v840_v5 = vadd.f32 -1.0, %v1083_v60  ;;  %v489_v57 = vpop.permute.xlu1 %488 }
 0x129   :  { %1088 = vpow2.f32 %v417_v61  ;;  %v388_v1 = vmin.f32 %v344_v62, 0.0  ;;  %1033 = vmatpush1.bf16.msra.mxu1 %v1032_v0  ;;  %vm371_vm3 = vcmp.gt.f32.partialorder %v344_v62, 0.0 }
 0x12a   :  { %v348_v7 = vpop.f32.mrb[30].mxu0  ;;  %1034 = vmatprep.subr.bf16.mxu1 %v1138_v3  ;;  %v452_v15 = vsel %vm367_vm13, %v1418_v24, %v840_v5  ;;  %vm724_vm13 = vcmask 588800  }
 0x12b   :  { %v1085_v8 = vpop.eup %1084  ;;  %v419_v9 = vmul.f32 1.442695, %v388_v1  ;;  %v349_v10 = vadd.f32 %v348_v7, %v148_v2  ;;  %v976_v11 = vpop.f32.mrb[31].mxu0 }
 0x12c   :  { %v841_v12 = vadd.f32 -1.0, %v1085_v8  ;;  %v499_v7 = vpop.permute.xlu1 %498 }
 0x12d   :  { %1090 = vpow2.f32 %v419_v9  ;;  %v389_v4 = vmin.f32 %v349_v10, 0.0  ;;  %vm372_vm4 = vcmp.gt.f32.partialorder %v349_v10, 0.0 }
 0x12e   :  { %v353_v14 = vpop.f32.mrb[32].mxu0  ;;  %v453_v16 = vsel %vm368_vm14, %v329_v34, %v841_v12 }
 0x12f   :  { %v1087_v17 = vpop.eup %1086  ;;  %v421_v18 = vmul.f32 1.442695, %v389_v4  ;;  %v354_v19 = vadd.f32 %v353_v14, %v153_v13  ;;  %v979_v20 = vpop.f32.mrb[33].mxu0  ;;  %v1035_v21 = vpack.c.bf16 %v453_v16, %v452_v15 }
 0x130   :  { %v842_v23 = vadd.f32 -1.0, %v1087_v17 }
 0x131   :  { %1092 = vpow2.f32 %v421_v18  ;;  %v390_v22 = vmin.f32 %v354_v19, 0.0  ;;  %1036 = vmatpush1.bf16.msra.mxu1 %v1035_v21  ;;  %vm373_vm5 = vcmp.gt.f32.partialorder %v354_v19, 0.0  ;;  %v509_v18 = vpop.permute.xlu1 %508 }
 0x132   :  { %1037 = vmatprep.subr.bf16.mxu1 %v1138_v3  ;;  %v454_v24 = vsel %vm369_vm15, %v1424_v43, %v842_v23  ;;  %v464_v43 = vld [vmem:[%s1522_s3 + $0x28] sm:$0xff] }
 0x133   :  { %v1089_v25 = vpop.eup %1088  ;;  %v423_v26 = vmul.f32 1.442695, %v390_v22 }
 0x134   :  { %v843_v27 = vadd.f32 -1.0, %v1089_v25 }
 0x135   :  { %1094 = vpow2.f32 %v423_v26 }
 0x136   :  { %v455_v28 = vsel %vm370_vm1, %v339_v53, %v843_v27  ;;  %v471_v53 = vld [vmem:[%s1522_s3 + $0x60] sm:$0xff] }
 0x137   :  { %v1091_v29 = vpop.eup %1090  ;;  %v1038_v31 = vpack.c.bf16 %v455_v28, %v454_v24 }
 0x138   :  { %v844_v32 = vadd.f32 -1.0, %v1091_v29 }
 0x139   :  { %1039 = vmatpush1.bf16.msra.mxu1 %v1038_v31 }
 0x13a   :  { %1040 = vmatprep.subr.bf16.mxu1 %v1138_v3  ;;  %v456_v30 = vsel %vm371_vm3, %v344_v62, %v844_v32  ;;  %v494_v62 = vpop.permute.xlu0 %493 }
 0x13b   :  { %v1093_v33 = vpop.eup %1092 }
 0x13c   :  { %v845_v34 = vadd.f32 -1.0, %v1093_v33 }
 0x13e   :  { %v457_v35 = vsel %vm372_vm4, %v349_v10, %v845_v34  ;;  %v504_v4 = vpop.permute.xlu0 %503 }
 0x13f   :  { %v1095_v36 = vpop.eup %1094  ;;  %v1041_v37 = vpack.c.bf16 %v457_v35, %v456_v30  ;;  %v519_v30 = vpop.permute.xlu1 %518 }
 0x140   :  { %v846_v38 = vadd.f32 -1.0, %v1095_v36 }
 0x141   :  { %1042 = vmatpush1.bf16.msra.mxu1 %v1041_v37 }
 0x142   :  { %591 = vmatprep.subr.mxu1 %v1140_v6  ;;  %v458_v40 = vsel %vm373_vm5, %v354_v19, %v846_v38  ;;  %v514_v26 = vpop.permute.xlu0 %513 }
 0x145   :  { %592 = vmatpush1.msra.mxu1 %v458_v40 }
 0x146   :  { %624 = vmatmul.mubr.f32.vlgmr.msra.gmra.mrb[0].mxu1 %v459_v39  ;;  %1043 = vmatprep.subr.bf16.mxu1 %v1138_v3 }
 0x147   :  { %848 = vmatprep.mubr.msk.f32.mxu1 %vm531_vm2, %v462_v41 }
 0x14a   :  { %629 = vmatmul.mubr.f32.gmra.mrb[2].mxu1 %v461_v42 }
 0x14b   :  { %849 = vmatprep.mubr.msk.f32.mxu1 %vm531_vm2, %v464_v43 }
 0x14e   :  { %634 = vmatmul.mubr.f32.gmra.mrb[4].mxu1 %v463_v44  ;;  %v524_v44 = vpop.permute.xlu0 %523 }
 0x14f   :  { %850 = vmatprep.mubr.msk.f32.mxu1 %vm531_vm2, %v466_v45 }
 0x152   :  { %639 = vmatmul.mubr.f32.gmra.mrb[6].mxu1 %v465_v46 }
 0x153   :  { %851 = vmatprep.mubr.msk.f32.mxu1 %vm531_vm2, %v468_v47 }
 0x156   :  { %644 = vmatmul.mubr.f32.gmra.mrb[8].mxu1 %v467_v49 }
 0x157   :  { %852 = vmatprep.mubr.msk.f32.mxu1 %vm531_vm2, %v470_v50 }
 0x15a   :  { %649 = vmatmul.mubr.f32.gmra.mrb[10].mxu1 %v469_v51 }
 0x15b   :  { %853 = vmatprep.mubr.msk.f32.mxu1 %vm531_vm2, %v472_v52 }
 0x15e   :  { %654 = vmatmul.mubr.f32.gmra.mrb[12].mxu1 %v471_v53 }
 0x15f   :  { %854 = vmatprep.mubr.msk.f32.mxu1 %vm531_vm2, %v474_v48  ;;  %v529_v48 = vpop.permute.xlu1 %528 }
 0x162   :  { %659 = vmatmul.mubr.f32.gmra.mrb[14].mxu1 %v473_v54 }
 0x163   :  { %855 = vmatprep.mubr.msk.f32.mxu1 %vm531_vm2, %v476_v55 }
 0x166   :  { %664 = vmatmul.mubr.f32.gmra.mrb[16].mxu1 %v475_v56 }
 0x167   :  { %998 = vmatprep.mubr.msk.f32.mxu1 %vm1139_vm0, %v1140_v6 }
 0x219   :  { %v625_v58 = vpop.f32.mrb[0].mxu1 }
 0x21a   :  { %v626_v59 = vadd.f32 %v625_v58, %v489_v57  ;;  %v627_v60 = vpop.f32.mrb[1].mxu1 }
 0x21c   :  { %v678_v61 = vmin.f32 %v626_v59, 0.0  ;;  %vm669_vm0 = vcmp.gt.f32.partialorder %v626_v59, 0.0 }
 0x21d   :  { %v630_v63 = vpop.f32.mrb[2].mxu1 }
 0x21e   :  { %v687_v0 = vmul.f32 1.442695, %v678_v61  ;;  %v631_v1 = vadd.f32 %v630_v63, %v494_v62  ;;  %v632_v2 = vpop.f32.mrb[3].mxu1 }
 0x220   :  { %1096 = vpow2.f32 %v687_v0  ;;  %v679_v5 = vmin.f32 %v631_v1, 0.0  ;;  %vm670_vm2 = vcmp.gt.f32.partialorder %v631_v1, 0.0 }
 0x221   :  { %v635_v8 = vpop.f32.mrb[4].mxu1 }
 0x222   :  { %v689_v9 = vmul.f32 1.442695, %v679_v5  ;;  %v636_v10 = vadd.f32 %v635_v8, %v499_v7  ;;  %v637_v11 = vpop.f32.mrb[5].mxu1 }
 0x224   :  { %1098 = vpow2.f32 %v689_v9  ;;  %v680_v12 = vmin.f32 %v636_v10, 0.0  ;;  %vm671_vm6 = vcmp.gt.f32.partialorder %v636_v10, 0.0 }
 0x225   :  { %v640_v13 = vpop.f32.mrb[6].mxu1 }
 0x226   :  { %v691_v14 = vmul.f32 1.442695, %v680_v12  ;;  %v641_v15 = vadd.f32 %v640_v13, %v504_v4  ;;  %v642_v16 = vpop.f32.mrb[7].mxu1 }
 0x228   :  { %1100 = vpow2.f32 %v691_v14  ;;  %v681_v17 = vmin.f32 %v641_v15, 0.0  ;;  %vm672_vm7 = vcmp.gt.f32.partialorder %v641_v15, 0.0 }
 0x229   :  { %v645_v19 = vpop.f32.mrb[8].mxu1 }
 0x22a   :  { %v1097_v20 = vpop.eup %1096  ;;  %v693_v21 = vmul.f32 1.442695, %v681_v17  ;;  %v646_v22 = vadd.f32 %v645_v19, %v509_v18  ;;  %v647_v23 = vpop.f32.mrb[9].mxu1  ;;  %v723_v17 = vld [vmem:[%s1524_s5] sm:$0xff] }
 0x22b   :  { %v856_v27 = vadd.f32 -1.0, %v1097_v20 }
 0x22c   :  { %1102 = vpow2.f32 %v693_v21  ;;  %v682_v25 = vmin.f32 %v646_v22, 0.0  ;;  %vm673_vm8 = vcmp.gt.f32.partialorder %v646_v22, 0.0 }
 0x22d   :  { %v650_v24 = vpop.f32.mrb[10].mxu1  ;;  %v714_v35 = vsel %vm669_vm0, %v626_v59, %v856_v27 }
 0x22e   :  { %v1099_v28 = vpop.eup %1098  ;;  %v695_v29 = vmul.f32 1.442695, %v682_v25  ;;  %v651_v31 = vadd.f32 %v650_v24, %v514_v26  ;;  %v652_v32 = vpop.f32.mrb[11].mxu1 }
 0x22f   :  { %v857_v33 = vadd.f32 -1.0, %v1099_v28 }
 0x230   :  { %1104 = vpow2.f32 %v695_v29  ;;  %v683_v34 = vmin.f32 %v651_v31, 0.0  ;;  %vm674_vm9 = vcmp.gt.f32.partialorder %v651_v31, 0.0 }
 0x231   :  { %v715_v36 = vsel %vm670_vm2, %v631_v1, %v857_v33  ;;  %v655_v37 = vpop.f32.mrb[12].mxu1 }
 0x232   :  { %v1101_v38 = vpop.eup %1100  ;;  %v1044_v39 = vpack.c.bf16 %v715_v36, %v714_v35  ;;  %v697_v40 = vmul.f32 1.442695, %v683_v34  ;;  %v656_v41 = vadd.f32 %v655_v37, %v519_v30  ;;  %v657_v42 = vpop.f32.mrb[13].mxu1 }
 0x233   :  { %v858_v45 = vadd.f32 -1.0, %v1101_v38 }
 0x234   :  { %1106 = vpow2.f32 %v697_v40  ;;  %v684_v43 = vmin.f32 %v656_v41, 0.0  ;;  %1045 = vmatpush3.bf16.msra.mxu1 %v1044_v39  ;;  %vm675_vm10 = vcmp.gt.f32.partialorder %v656_v41, 0.0 }
 0x235   :  { %v660_v46 = vpop.f32.mrb[14].mxu1  ;;  %1046 = vmatprep.subr.bf16.mxu1 %v1138_v3  ;;  %v716_v54 = vsel %vm671_vm6, %v636_v10, %v858_v45 }
 0x236   :  { %v1103_v47 = vpop.eup %1102  ;;  %v699_v49 = vmul.f32 1.442695, %v684_v43  ;;  %v661_v50 = vadd.f32 %v660_v46, %v524_v44  ;;  %v662_v51 = vpop.f32.mrb[15].mxu1 }
 0x237   :  { %v859_v52 = vadd.f32 -1.0, %v1103_v47 }
 0x238   :  { %1108 = vpow2.f32 %v699_v49  ;;  %v685_v53 = vmin.f32 %v661_v50, 0.0  ;;  %vm676_vm11 = vcmp.gt.f32.partialorder %v661_v50, 0.0 }
 0x239   :  { %v717_v55 = vsel %vm672_vm7, %v641_v15, %v859_v52  ;;  %v665_v56 = vpop.f32.mrb[16].mxu1 }
 0x23a   :  { %v1105_v57 = vpop.eup %1104  ;;  %v1047_v58 = vpack.c.bf16 %v717_v55, %v716_v54  ;;  %v701_v59 = vmul.f32 1.442695, %v685_v53  ;;  %v666_v60 = vadd.f32 %v665_v56, %v529_v48  ;;  %v667_v61 = vpop.f32.mrb[17].mxu1 }
 0x23b   :  { %v860_v63 = vadd.f32 -1.0, %v1105_v57 }
 0x23c   :  { %1110 = vpow2.f32 %v701_v59  ;;  %v686_v62 = vmin.f32 %v666_v60, 0.0  ;;  %1048 = vmatpush3.bf16.msra.mxu1 %v1047_v58  ;;  %vm677_vm12 = vcmp.gt.f32.partialorder %v666_v60, 0.0 }
 0x23d   :  { %1049 = vmatprep.subr.bf16.mxu1 %v1138_v3  ;;  %v718_v5 = vsel %vm673_vm8, %v646_v22, %v860_v63 }
 0x23e   :  { %v1107_v0 = vpop.eup %1106  ;;  %v703_v1 = vmul.f32 1.442695, %v686_v62 }
 0x23f   :  { %v861_v2 = vadd.f32 -1.0, %v1107_v0 }
 0x240   :  { %1112 = vpow2.f32 %v703_v1 }
 0x241   :  { %v719_v7 = vsel %vm674_vm9, %v651_v31, %v861_v2 }
 0x242   :  { %v1109_v8 = vpop.eup %1108  ;;  %v1050_v9 = vpack.c.bf16 %v719_v7, %v718_v5 }
 0x243   :  { %v862_v10 = vadd.f32 -1.0, %v1109_v8 }
 0x244   :  { %1051 = vmatpush3.bf16.msra.mxu1 %v1050_v9 }
 0x245   :  { %1052 = vmatprep.subr.bf16.mxu1 %v1138_v3  ;;  %v720_v4 = vsel %vm675_vm10, %v656_v41, %v862_v10 }
 0x246   :  { %v1111_v11 = vpop.eup %1110 }
 0x247   :  { %v863_v12 = vadd.f32 -1.0, %v1111_v11 }
 0x249   :  { %v721_v13 = vsel %vm676_vm11, %v661_v50, %v863_v12 }
 0x24a   :  { %v1113_v14 = vpop.eup %1112  ;;  %v1053_v15 = vpack.c.bf16 %v721_v13, %v720_v4 }
 0x24b   :  { %v864_v16 = vadd.f32 -1.0, %v1113_v14 }
 0x24c   :  { %1054 = vmatpush3.bf16.msra.mxu1 %v1053_v15 }
 0x24d   :  { %996 = vmatprep.subr.mxu1 %v1140_v6  ;;  %v722_v18 = vsel %vm677_vm12, %v666_v60, %v864_v16 }
 0x250   :  { %997 = vmatpush3.msra.mxu1 %v722_v18 }
 0x251   :  { %999 = vmatmul.mubr.msk.f32.vlgmr.msra.gmra.mrb[18].mxu1 %vm724_vm13, %v723_v17 }
 0x324   :  { %v794_v3 = vpop.f32.mrb[18].mxu1 }
 0x325   :  { %798 = vst [vmem:[#allocation2] sm:$0xff] %v794_v3  ;;  %v1000_v19 = vpop.f32.mrb[19].mxu1 }
 0x326   :  { %1125 = shalt.err (!%p1122_p4)
}
 0x327   :  { %s1126_s5 = scalar_lea.hbm %s1525_s6, 128 }
 0x328   :  { %p1127_p5 = scmp.ne.s32.totalorder %s1525_s6, %s1126_s5  ;;  %p1130_p6 = scmp.lt.u32.totalorder %s1126_s5, %s1525_s6 }
 0x32a   :  { %p1132_p7 = pnand %p1130_p6, %p1127_p5 }
 0x32c   :  { %1135 = shalt.err (!%p1132_p7)
}
 0x32d   :  { %808 = dma.vmem_to_hbm [thread:$0]  %s806_s13, 128, %s1525_s6, [#allocation3]  }
 0x32e   :  { %1136 = dma.done.wait [#allocation3], 128  }
 0x32f   :  { %1137 = vsyncadd [#allocation3], 4294967168 }
 0x330   :  { %812 = vsyncpa [#allocation3], 1 }

</bundles_post_ra>
